<compile_context>
chip_gen: v7x
topology: tpu7x:2x2x1
jax: 0.10.0
libtpu: 0.0.40
codegen_flags: <defaults>
</compile_context>

<pallas_src>
import jax
import jax.numpy as jnp
from jax.experimental import pallas as pl
from jax.experimental.pallas import tpu as pltpu


def mlp_kernel(x_ref, w1_ref, b1_ref, w2_ref, b2_ref, w3_ref, b3_ref, o_ref):
    # Three MXU matmuls (bf16 inputs, f32 accumulation) + f32 bias/tanh, fused in VMEM.
    x = x_ref[...]  # bf16 [tile, 768]
    h1 = jnp.tanh(
        jnp.dot(x, w1_ref[...], preferred_element_type=jnp.float32) + b1_ref[...]
    )
    h2 = jnp.tanh(
        jnp.dot(h1.astype(jnp.bfloat16), w2_ref[...],
                preferred_element_type=jnp.float32) + b2_ref[...]
    )
    o_ref[...] = (
        jnp.dot(h2.astype(jnp.bfloat16), w3_ref[...],
                preferred_element_type=jnp.float32) + b3_ref[...]
    ).astype(o_ref.dtype)
    # Note: output last dim is 4 (< 128 lanes) -> masked stores, but output volume is
    # negligible next to the x read; not worth padding per the perf review.


def malicious_class_detector(x, params, *, batch_tile=512):
    """x: [B, 768] float32 -> logits [B, 4] float32."""
    w1, b1, w2, b2, w3, b3 = params
    B, D = x.shape
    assert D == 768

    # bf16 inputs/weights halve HBM traffic of x (the dominant cost); biases stay f32.
    xb = x.astype(jnp.bfloat16)
    w1b = w1.astype(jnp.bfloat16)
    w2b = w2.astype(jnp.bfloat16)
    w3b = w3.astype(jnp.bfloat16)

    # Pad batch up to a multiple of batch_tile so the tile size is independent of B.
    n_tiles = pl.cdiv(B, batch_tile)
    Bp = n_tiles * batch_tile
    if Bp != B:
        xb = jnp.pad(xb, ((0, Bp - B), (0, 0)))

    # Weights/biases are tiny (~205 KB total) and stay resident via the constant map.
    full = lambda a: pl.BlockSpec(a.shape, lambda i: (0, 0))

    out = pl.pallas_call(
        mlp_kernel,
        out_shape=jax.ShapeDtypeStruct((Bp, 4), jnp.float32),
        grid_spec=pltpu.PrefetchScalarGridSpec(
            num_scalar_prefetch=0,
            grid=(n_tiles,),
            in_specs=[
                pl.BlockSpec((batch_tile, 768), lambda i: (i, 0)),  # x tile
                full(w1b),  # (768, 64)  bf16
                full(b1),   # (1, 64)    f32
                full(w2b),  # (64, 32)   bf16
                full(b2),   # (1, 32)    f32
                full(w3b),  # (32, 4)    bf16
                full(b3),   # (1, 4)     f32
            ],
            out_specs=pl.BlockSpec((batch_tile, 4), lambda i: (i, 0)),
        ),
        compiler_params=pltpu.CompilerParams(
            dimension_semantics=("parallel",),
            # Headroom for larger tiles (v5e default scoped VMEM is only 16 MiB);
            # 32 MiB is within physical VMEM on every generation incl. v7x.
            vmem_limit_bytes=32 << 20,
        ),
    )(xb, w1b, b1, w2b, b2, w3b, b3)

    return out[:B] if Bp != B else out


def init_params(key):
    """Deterministic init mirroring nn.Linear default (U(-1/sqrt(fan_in), +)).
    Weights stored transposed: [in, out]; everything f32 (cast happens in wrapper)."""
    dims = [(768, 64), (64, 32), (32, 4)]
    params = []
    for (fan_in, fan_out) in dims:
        key, kw, kb = jax.random.split(key, 3)
        bound = 1.0 / jnp.sqrt(fan_in)
        w = jax.random.uniform(kw, (fan_in, fan_out), jnp.float32, -bound, bound)
        b = jax.random.uniform(kb, (1, fan_out), jnp.float32, -bound, bound)
        params += [w, b]
    return tuple(params)


def reference(x, params):
    w1, b1, w2, b2, w3, b3 = params
    h1 = jnp.tanh(x @ w1 + b1)
    h2 = jnp.tanh(h1 @ w2 + b2)
    return h2 @ w3 + b3


if __name__ == "__main__":
    key = jax.random.PRNGKey(0)
    kx, kp = jax.random.split(key)

    B = 8  # small test batch (also exercises the pad-to-tile path); feature dim fixed at 768
    x = jax.random.normal(kx, (B, 768), jnp.float32)
    params = init_params(kp)

    out = malicious_class_detector(x, params)
    out = jax.block_until_ready(out)

    ref = reference(x, params)  # full-f32 reference
    assert out.shape == (B, 4)
    # bf16 inputs/weights with f32 accumulation: loosen tolerance vs. the f32 reference.
    assert jnp.allclose(out, ref, atol=2e-2, rtol=2e-2), (
        float(jnp.max(jnp.abs(out - ref)))
    )

    print("KERNEL_OK")
</pallas_src>

<mosaic_0001>
module attributes {stable_mosaic.version = 11 : i64} {
  func.func @mlp_kernel(%arg0: i32, %arg1: memref<512x768xbf16, #tpu.memory_space<vmem>>, %arg2: memref<768x64xbf16, #tpu.memory_space<vmem>>, %arg3: memref<1x64xf32, #tpu.memory_space<vmem>>, %arg4: memref<64x32xbf16, #tpu.memory_space<vmem>>, %arg5: memref<1x32xf32, #tpu.memory_space<vmem>>, %arg6: memref<32x4xbf16, #tpu.memory_space<vmem>>, %arg7: memref<1x4xf32, #tpu.memory_space<vmem>>, %arg8: memref<512x4xf32, #tpu.memory_space<vmem>>) attributes {dimension_semantics = [#tpu.dimension_semantics<parallel>], iteration_bounds = array<i64: 1>, scalar_prefetch = 0 : i64, scratch_operands = 0 : i64, tpu.core_type = #tpu.core_type<tc>, window_params = [{transform_indices = @transform_0, window_bounds = array<i64: 512, 768>}, {pipeline_mode = #tpu.pipeline_mode<synchronous>, transform_indices = @transform_1, window_bounds = array<i64: 768, 64>}, {pipeline_mode = #tpu.pipeline_mode<synchronous>, transform_indices = @transform_2, window_bounds = array<i64: 1, 64>}, {pipeline_mode = #tpu.pipeline_mode<synchronous>, transform_indices = @transform_3, window_bounds = array<i64: 64, 32>}, {pipeline_mode = #tpu.pipeline_mode<synchronous>, transform_indices = @transform_4, window_bounds = array<i64: 1, 32>}, {pipeline_mode = #tpu.pipeline_mode<synchronous>, transform_indices = @transform_5, window_bounds = array<i64: 32, 4>}, {pipeline_mode = #tpu.pipeline_mode<synchronous>, transform_indices = @transform_6, window_bounds = array<i64: 1, 4>}, {transform_indices = @transform_7, window_bounds = array<i64: 512, 4>}]} {
    %c0 = arith.constant 0 : index
    %c0_0 = arith.constant 0 : index
    %0 = vector.load %arg1[%c0, %c0_0] : memref<512x768xbf16, #tpu.memory_space<vmem>>, vector<512x768xbf16>
    %c0_1 = arith.constant 0 : index
    %c0_2 = arith.constant 0 : index
    %1 = vector.load %arg2[%c0_1, %c0_2] : memref<768x64xbf16, #tpu.memory_space<vmem>>, vector<768x64xbf16>
    %cst = arith.constant dense<0.000000e+00> : vector<512x64xf32>
    %2 = tpu.matmul %0, %1, %cst {dimension_numbers = #tpu.dot_dimension_numbers<[1], [0], [0], [1], [0, 0, 1, 1], [], []>} : vector<512x768xbf16>, vector<768x64xbf16>, vector<512x64xf32> -> vector<512x64xf32>
    %c0_3 = arith.constant 0 : index
    %c0_4 = arith.constant 0 : index
    %3 = vector.load %arg3[%c0_3, %c0_4] : memref<1x64xf32, #tpu.memory_space<vmem>>, vector<1x64xf32>
    %4 = vector.broadcast %3 : vector<1x64xf32> to vector<512x64xf32>
    %5 = arith.addf %2, %4 : vector<512x64xf32>
    %6 = math.tanh %5 : vector<512x64xf32>
    %7 = arith.truncf %6 : vector<512x64xf32> to vector<512x64xbf16>
    %c0_5 = arith.constant 0 : index
    %c0_6 = arith.constant 0 : index
    %8 = vector.load %arg4[%c0_5, %c0_6] : memref<64x32xbf16, #tpu.memory_space<vmem>>, vector<64x32xbf16>
    %cst_7 = arith.constant dense<0.000000e+00> : vector<512x32xf32>
    %9 = tpu.matmul %7, %8, %cst_7 {dimension_numbers = #tpu.dot_dimension_numbers<[1], [0], [0], [1], [0, 0, 1, 1], [], []>} : vector<512x64xbf16>, vector<64x32xbf16>, vector<512x32xf32> -> vector<512x32xf32>
    %c0_8 = arith.constant 0 : index
    %c0_9 = arith.constant 0 : index
    %10 = vector.load %arg5[%c0_8, %c0_9] : memref<1x32xf32, #tpu.memory_space<vmem>>, vector<1x32xf32>
    %11 = vector.broadcast %10 : vector<1x32xf32> to vector<512x32xf32>
    %12 = arith.addf %9, %11 : vector<512x32xf32>
    %13 = math.tanh %12 : vector<512x32xf32>
    %14 = arith.truncf %13 : vector<512x32xf32> to vector<512x32xbf16>
    %c0_10 = arith.constant 0 : index
    %c0_11 = arith.constant 0 : index
    %15 = vector.load %arg6[%c0_10, %c0_11] : memref<32x4xbf16, #tpu.memory_space<vmem>>, vector<32x4xbf16>
    %cst_12 = arith.constant dense<0.000000e+00> : vector<512x4xf32>
    %16 = tpu.matmul %14, %15, %cst_12 {dimension_numbers = #tpu.dot_dimension_numbers<[1], [0], [0], [1], [0, 0, 1, 1], [], []>} : vector<512x32xbf16>, vector<32x4xbf16>, vector<512x4xf32> -> vector<512x4xf32>
    %c0_13 = arith.constant 0 : index
    %c0_14 = arith.constant 0 : index
    %17 = vector.load %arg7[%c0_13, %c0_14] : memref<1x4xf32, #tpu.memory_space<vmem>>, vector<1x4xf32>
    %18 = vector.broadcast %17 : vector<1x4xf32> to vector<512x4xf32>
    %19 = arith.addf %16, %18 : vector<512x4xf32>
    %c0_15 = arith.constant 0 : index
    %c0_16 = arith.constant 0 : index
    %20 = vector.load %arg8[%c0_15, %c0_16] : memref<512x4xf32, #tpu.memory_space<vmem>>, vector<512x4xf32>
    tpu.vector_store %arg8[%c0_15, %c0_16], %19 {strides = array<i32>} : memref<512x4xf32, #tpu.memory_space<vmem>>, vector<512x4xf32>,
    return
  }
  func.func @transform_0(%arg0: i32) -> (i32, i32) {
    %c0_i32 = arith.constant 0 : i32
    %c0_i32_0 = arith.constant 0 : i32
    return %arg0, %c0_i32 : i32, i32
  }
  func.func @transform_1(%arg0: i32) -> (i32, i32) {
    %c0_i32 = arith.constant 0 : i32
    %c0_i32_0 = arith.constant 0 : i32
    %c0_i32_1 = arith.constant 0 : i32
    return %c0_i32, %c0_i32_0 : i32, i32
  }
  func.func @transform_2(%arg0: i32) -> (i32, i32) {
    %c0_i32 = arith.constant 0 : i32
    %c0_i32_0 = arith.constant 0 : i32
    %c0_i32_1 = arith.constant 0 : i32
    return %c0_i32, %c0_i32_0 : i32, i32
  }
  func.func @transform_3(%arg0: i32) -> (i32, i32) {
    %c0_i32 = arith.constant 0 : i32
    %c0_i32_0 = arith.constant 0 : i32
    %c0_i32_1 = arith.constant 0 : i32
    return %c0_i32, %c0_i32_0 : i32, i32
  }
  func.func @transform_4(%arg0: i32) -> (i32, i32) {
    %c0_i32 = arith.constant 0 : i32
    %c0_i32_0 = arith.constant 0 : i32
    %c0_i32_1 = arith.constant 0 : i32
    return %c0_i32, %c0_i32_0 : i32, i32
  }
  func.func @transform_5(%arg0: i32) -> (i32, i32) {
    %c0_i32 = arith.constant 0 : i32
    %c0_i32_0 = arith.constant 0 : i32
    %c0_i32_1 = arith.constant 0 : i32
    return %c0_i32, %c0_i32_0 : i32, i32
  }
  func.func @transform_6(%arg0: i32) -> (i32, i32) {
    %c0_i32 = arith.constant 0 : i32
    %c0_i32_0 = arith.constant 0 : i32
    %c0_i32_1 = arith.constant 0 : i32
    return %c0_i32, %c0_i32_0 : i32, i32
  }
  func.func @transform_7(%arg0: i32) -> (i32, i32) {
    %c0_i32 = arith.constant 0 : i32
    %c0_i32_0 = arith.constant 0 : i32
    return %arg0, %c0_i32 : i32, i32
  }
}

</mosaic_0001>

<bundles_post_ra>
// kernel: tpu_custom_call.1
= control target key start
LH: loop header
LB: loop body
LE: loop exit
PB: predicated region body
PF: predicated region fallthrough
CT: control target
= control target key end

     0   :  { %12 = vsyncpa [#allocation3], 0  ;;  %s4953_s24 = smov [#allocation2]   ;;  %s5938_s0 = inlined_call_operand.hbm [shape: bf16[512,768], index: 0, kind: input, shape index: {}]   ;;  %s5939_s1 = inlined_call_operand.vmem [shape: bf16[768,64], index: 1, kind: input, shape index: {}]   ;;  %s5940_s2 = inlined_call_operand.vmem [shape: f32[1,64], index: 2, kind: input, shape index: {}]   ;;  %s5941_s3 = inlined_call_operand.vmem [shape: bf16[64,32], index: 3, kind: input, shape index: {}]   ;;  %s5942_s4 = inlined_call_operand.vmem [shape: f32[1,32], index: 4, kind: input, shape index: {}]   ;;  %s5943_s5 = inlined_call_operand.vmem [shape: bf16[32,4], index: 5, kind: input, shape index: {}]   ;;  %s5944_s6 = inlined_call_operand.vmem [shape: f32[1,4], index: 6, kind: input, shape index: {}]   ;;  %s5945_s7 = inlined_call_operand.vmem [shape: f32[512,4], index: 7, kind: output, shape index: {}]  }
   0x1   :  { %s18_s25 = sshll.u32 %s4953_s24, 4  ;;  %s4929_s28 = scalar_lea.hbm %s5938_s0, 24576  ;;  %s19_s25 = int_to_ptr.vmem [resolvable:$true] %s18_s25 }
   0x2   :  { %p4930_p0 = scmp.ne.s32.totalorder %s5938_s0, %s4929_s28  ;;  %p4933_p1 = scmp.lt.u32.totalorder %s4929_s28, %s5938_s0 }
   0x4   :  { %p4935_p2 = pnand %p4933_p1, %p4930_p0 }
   0x6   :  { %4938 = shalt.err (!%p4935_p2)
}
   0x7   :  { %s4939_s10 = scalar_lea.vmem %s19_s25, 24576  ;;  %p4944_p4 = scmp.lt.s32.totalorder %s19_s25, %s19_s25 }
   0x8   :  { %p4940_p3 = scmp.ne.s32.totalorder %s19_s25, %s4939_s10  ;;  %p4945_p5 = scmp.lt.s32.totalorder %s4939_s10, %s4939_s10 }
   0xa   :  { %p4946_p6 = por %p4945_p5, %p4944_p4 }
   0xc   :  { %p4947_p7 = pnand %p4946_p6, %p4940_p3 }
   0xe   :  { %4950 = shalt.err (!%p4947_p7)
}
   0xf   :  { %s4954_s11 = smov 384   ;;  %s4955_s12 = smov 24  }
  0x10   :  { %24 = dma.hbm_to_vmem [thread:$0]  %s5938_s0, 24576, %s19_s25, [#allocation3], %s4954_s11, %s4954_s11, %s4955_s12  }
  0x11   :  { %4951 = dma.done.wait [#allocation3], 24576  }
  0x12   :  { %4952 = vsyncadd [#allocation3], 4294942720  ;;  %v4956_v0 = vmov 0   ;;  %v4330_v1 = vld [vmem:[%s5939_s1 + $0x80] sm:$0xff]   ;;  %v4331_v2 = vld [vmem:[%s5939_s1 + $0x88] sm:$0xff]   ;;  %vm2586_vm0 = vcmask 523264  }
  0x13   :  { %1873 = vmatprep.subr.bf16.mxu0 %v4956_v0  ;;  %1584 = vmatprep.subr.bf16.mxu1 %v4956_v0  ;;  %v4332_v3 = vld [vmem:[%s5939_s1 + $0x90] sm:$0xff]   ;;  %v4333_v4 = vld [vmem:[%s5939_s1 + $0x98] sm:$0xff]   ;;  %v4334_v5 = vld [vmem:[%s5939_s1 + $0xa0] sm:$0xff]   ;;  %vm3091_vm1 = vcmask 261120   ;;  %vm3477_vm2 = vcmask 31744  }
  0x14   :  { %1874 = vmatpush1.bf16.msra.mxu0 %v4330_v1  ;;  %v4348_v6 = vld [vmem:[#allocation2 + $0xc] ss:$24 sps:$4 sm:$0xff]   ;;  %v4336_v8 = vld [vmem:[%s5939_s1 + $0xb0] sm:$0xff]   ;;  %v4337_v9 = vld [vmem:[%s5939_s1 + $0xb8] sm:$0xff]  }
  0x15   :  { %1875 = vmatprep.subr.bf16.mxu0 %v4956_v0  ;;  %v4335_v7 = vld [vmem:[%s5939_s1 + $0xa8] sm:$0xff]   ;;  %1905 = vmatprep.mubr.bf16.mxu0 %v4348_v6  ;;  %v4338_v10 = vld [vmem:[%s5939_s1 + $0xc0] sm:$0xff]   ;;  %v4340_v12 = vld [vmem:[%s5939_s1 + $0xd0] sm:$0xff]  }
  0x16   :  { %v4339_v11 = vld [vmem:[%s5939_s1 + $0xc8] sm:$0xff]   ;;  %v4341_v13 = vld [vmem:[%s5939_s1 + $0xd8] sm:$0xff]   ;;  %v4342_v14 = vld [vmem:[%s5939_s1 + $0xe0] sm:$0xff]  }
  0x17   :  { %v4343_v15 = vld [vmem:[%s5939_s1 + $0xe8] sm:$0xff]   ;;  %v4344_v16 = vld [vmem:[%s5939_s1 + $0xf0] sm:$0xff]   ;;  %v4345_v17 = vld [vmem:[%s5939_s1 + $0xf8] sm:$0xff]  }
  0x18   :  { %1876 = vmatpush1.bf16.msra.mxu0 %v4331_v2  ;;  %v4346_v18 = vld [vmem:[#allocation2 + $0x8] ss:$24 sps:$4 sm:$0xff]   ;;  %v4350_v20 = vld [vmem:[#allocation2 + $0x3c] ss:$24 sps:$4 sm:$0xff]   ;;  %v4352_v22 = vld [vmem:[#allocation2 + $0x38] ss:$24 sps:$4 sm:$0xff]  }
  0x19   :  { %1877 = vmatprep.subr.bf16.mxu0 %v4956_v0  ;;  %v4349_v19 = vld [vmem:[%s5939_s1 + $0x100] sm:$0xff]   ;;  %v4356_v21 = vld [vmem:[%s5939_s1 + $0x108] sm:$0xff]   ;;  %v4363_v24 = vld [vmem:[%s5939_s1 + $0x110] sm:$0xff]  }
  0x1a   :  { %v4353_v23 = vld [vmem:[#allocation2 + $0x6c] ss:$24 sps:$4 sm:$0xff]   ;;  %v4370_v25 = vld [vmem:[%s5939_s1 + $0x118] sm:$0xff]   ;;  %v4355_v26 = vld [vmem:[#allocation2 + $0x68] ss:$24 sps:$4 sm:$0xff]  }
  0x1b   :  { %v4357_v27 = vld [vmem:[#allocation2 + $0x9c] ss:$24 sps:$4 sm:$0xff]   ;;  %v4377_v28 = vld [vmem:[%s5939_s1 + $0x120] sm:$0xff]   ;;  %v4384_v29 = vld [vmem:[%s5939_s1 + $0x128] sm:$0xff]  }
  0x1c   :  { %1878 = vmatpush1.bf16.msra.mxu0 %v4332_v3  ;;  %v4359_v30 = vld [vmem:[#allocation2 + $0x98] ss:$24 sps:$4 sm:$0xff]   ;;  %v4360_v31 = vld [vmem:[#allocation2 + $0xcc] ss:$24 sps:$4 sm:$0xff]   ;;  %v4362_v34 = vld [vmem:[#allocation2 + $0xc8] ss:$24 sps:$4 sm:$0xff]  }
  0x1d   :  { %1879 = vmatprep.subr.bf16.mxu0 %v4956_v0  ;;  %v4391_v32 = vld [vmem:[%s5939_s1 + $0x130] sm:$0xff]   ;;  %v4398_v33 = vld [vmem:[%s5939_s1 + $0x138] sm:$0xff]   ;;  %v4405_v36 = vld [vmem:[%s5939_s1 + $0x140] sm:$0xff]  }
  0x1e   :  { %v4364_v35 = vld [vmem:[#allocation2 + $0xfc] ss:$24 sps:$4 sm:$0xff]   ;;  %v4412_v37 = vld [vmem:[%s5939_s1 + $0x148] sm:$0xff]   ;;  %v4366_v38 = vld [vmem:[#allocation2 + $0xf8] ss:$24 sps:$4 sm:$0xff]  }
  0x1f   :  { %v4367_v39 = vld [vmem:[#allocation2 + $0x12c] ss:$24 sps:$4 sm:$0xff]   ;;  %v4419_v40 = vld [vmem:[%s5939_s1 + $0x150] sm:$0xff]   ;;  %v4369_v42 = vld [vmem:[#allocation2 + $0x128] ss:$24 sps:$4 sm:$0xff]  }
  0x20   :  { %1880 = vmatpush1.bf16.msra.mxu0 %v4333_v4  ;;  %v4423_v41 = vld [vmem:[%s5939_s1] sm:$0xff]   ;;  %v4371_v43 = vld [vmem:[#allocation2 + $0x15c] ss:$24 sps:$4 sm:$0xff]   ;;  %v4427_v44 = vld [vmem:[%s5939_s1 + $0x8] sm:$0xff]  }
  0x21   :  { %1881 = vmatprep.subr.bf16.mxu0 %v4956_v0  ;;  %1585 = vmatpush1.bf16.msra.mxu1 %v4423_v41  ;;  %v4428_v45 = vld [vmem:[%s5939_s1 + $0x158] sm:$0xff]   ;;  %v4429_v46 = vld [vmem:[%s5939_s1 + $0x10] sm:$0xff]   ;;  %v4374_v48 = vld [vmem:[#allocation2 + $0x18c] ss:$24 sps:$4 sm:$0xff]  }
  0x22   :  { %1586 = vmatprep.subr.bf16.mxu1 %v4956_v0  ;;  %v4373_v47 = vld [vmem:[#allocation2 + $0x158] ss:$24 sps:$4 sm:$0xff]   ;;  %v4434_v50 = vld [vmem:[%s5939_s1 + $0x20] sm:$0xff]   ;;  %v4378_v52 = vld [vmem:[#allocation2 + $0x1bc] ss:$24 sps:$4 sm:$0xff]  }
  0x23   :  { %v4433_v49 = vld [vmem:[%s5939_s1 + $0x18] sm:$0xff]   ;;  %v4376_v51 = vld [vmem:[#allocation2 + $0x188] ss:$24 sps:$4 sm:$0xff]   ;;  %v4440_v55 = vld [vmem:[%s5939_s1 + $0x30] sm:$0xff]  }
  0x24   :  { %1882 = vmatpush1.bf16.msra.mxu0 %v4334_v5  ;;  %v4438_v53 = vld [vmem:[%s5939_s1 + $0x28] sm:$0xff]   ;;  %v4439_v54 = vld [vmem:[%s5939_s1 + $0x160] sm:$0xff]   ;;  %v4380_v56 = vld [vmem:[#allocation2 + $0x1b8] ss:$24 sps:$4 sm:$0xff]  }
  0x25   :  { %1883 = vmatprep.subr.bf16.mxu0 %v4956_v0  ;;  %1587 = vmatpush1.bf16.msra.mxu1 %v4427_v44  ;;  %v4381_v57 = vld [vmem:[#allocation2 + $0x1ec] ss:$24 sps:$4 sm:$0xff]   ;;  %v4444_v58 = vld [vmem:[%s5939_s1 + $0x38] sm:$0xff]   ;;  %v4383_v60 = vld [vmem:[#allocation2 + $0x1e8] ss:$24 sps:$4 sm:$0xff]  }
  0x26   :  { %1588 = vmatprep.subr.bf16.mxu1 %v4956_v0  ;;  %v4445_v59 = vld [vmem:[%s5939_s1 + $0x40] sm:$0xff]   ;;  %v4385_v61 = vld [vmem:[#allocation2 + $0x21c] ss:$24 sps:$4 sm:$0xff]   ;;  %v4449_v62 = vld [vmem:[%s5939_s1 + $0x48] sm:$0xff]  }
  0x27   :  { %v4450_v63 = vld [vmem:[%s5939_s1 + $0x168] sm:$0xff]   ;;  %v4451_v1 = vld [vmem:[%s5939_s1 + $0x50] sm:$0xff]   ;;  %v4455_v4 = vld [vmem:[%s5939_s1 + $0x58] sm:$0xff]  }
  0x28   :  { %1884 = vmatpush1.bf16.msra.mxu0 %v4335_v7  ;;  %v4387_v2 = vld [vmem:[#allocation2 + $0x218] ss:$24 sps:$4 sm:$0xff]   ;;  %v4388_v3 = vld [vmem:[#allocation2 + $0x24c] ss:$24 sps:$4 sm:$0xff]   ;;  %v4390_v6 = vld [vmem:[#allocation2 + $0x248] ss:$24 sps:$4 sm:$0xff]  }
  0x29   :  { %1885 = vmatprep.subr.bf16.mxu0 %v4956_v0  ;;  %1589 = vmatpush1.bf16.msra.mxu1 %v4429_v46  ;;  %v4456_v5 = vld [vmem:[%s5939_s1 + $0x60] sm:$0xff]   ;;  %v4392_v7 = vld [vmem:[#allocation2 + $0x27c] ss:$24 sps:$4 sm:$0xff]   ;;  %v4422_v44 = vld [vmem:[#allocation2 + $0x3f8] ss:$24 sps:$4 sm:$0xff]  }
  0x2a   :  { %1590 = vmatprep.subr.bf16.mxu1 %v4956_v0  ;;  %v4420_v41 = vld [vmem:[#allocation2 + $0x3fc] ss:$24 sps:$4 sm:$0xff]  }
  0x2b   :  { %v4516_v46 = vld [vmem:[#allocation2 + $0x184] ss:$24 sps:$4 sm:$0xff]  }
  0x2c   :  { %1886 = vmatpush1.bf16.msra.mxu0 %v4336_v8  ;;  %v4460_v8 = vld [vmem:[%s5939_s1 + $0x68] sm:$0xff]  }
  0x2d   :  { %1887 = vmatprep.subr.bf16.mxu0 %v4956_v0  ;;  %1591 = vmatpush1.bf16.msra.mxu1 %v4433_v49  ;;  %v4430_v49 = vld [vmem:[#allocation2 + $0x45c] ss:$24 sps:$4 sm:$0xff]  }
  0x2e   :  { %1592 = vmatprep.subr.bf16.mxu1 %v4956_v0 }
  0x30   :  { %1888 = vmatpush1.bf16.msra.mxu0 %v4337_v9  ;;  %v4461_v9 = vld [vmem:[%s5939_s1 + $0x170] sm:$0xff]  }
  0x31   :  { %1889 = vmatprep.subr.bf16.mxu0 %v4956_v0  ;;  %1593 = vmatpush1.bf16.msra.mxu1 %v4434_v50  ;;  %v4522_v50 = vld [vmem:[#allocation2 + $0x1b4] ss:$24 sps:$4 sm:$0xff]  }
  0x32   :  { %1594 = vmatprep.subr.bf16.mxu1 %v4956_v0 }
  0x34   :  { %1890 = vmatpush1.bf16.msra.mxu0 %v4338_v10  ;;  %v4462_v10 = vld [vmem:[%s5939_s1 + $0x70] sm:$0xff]  }
  0x35   :  { %1891 = vmatprep.subr.bf16.mxu0 %v4956_v0  ;;  %1595 = vmatpush1.bf16.msra.mxu1 %v4438_v53  ;;  %v4435_v53 = vld [vmem:[#allocation2 + $0x48c] ss:$24 sps:$4 sm:$0xff]  }
  0x36   :  { %1596 = vmatprep.subr.bf16.mxu1 %v4956_v0 }
  0x38   :  { %1892 = vmatpush1.bf16.msra.mxu0 %v4339_v11  ;;  %v4394_v11 = vld [vmem:[#allocation2 + $0x278] ss:$24 sps:$4 sm:$0xff]  }
  0x39   :  { %1893 = vmatprep.subr.bf16.mxu0 %v4956_v0  ;;  %1597 = vmatpush1.bf16.msra.mxu1 %v4440_v55  ;;  %v4530_v55 = vld [vmem:[#allocation2 + $0x1e0] ss:$24 sps:$4 sm:$0xff]  }
  0x3a   :  { %1598 = vmatprep.subr.bf16.mxu1 %v4956_v0 }
  0x3c   :  { %1894 = vmatpush1.bf16.msra.mxu0 %v4340_v12  ;;  %v4395_v12 = vld [vmem:[#allocation2 + $0x2ac] ss:$24 sps:$4 sm:$0xff]  }
  0x3d   :  { %1895 = vmatprep.subr.bf16.mxu0 %v4956_v0  ;;  %1599 = vmatpush1.bf16.msra.mxu1 %v4444_v58  ;;  %v4534_v58 = vld [vmem:[#allocation2 + $0x214] ss:$24 sps:$4 sm:$0xff]  }
  0x3e   :  { %1600 = vmatprep.subr.bf16.mxu1 %v4956_v0 }
  0x40   :  { %1896 = vmatpush1.bf16.msra.mxu0 %v4341_v13  ;;  %v4466_v13 = vld [vmem:[%s5939_s1 + $0x78] sm:$0xff]  }
  0x41   :  { %1897 = vmatprep.subr.bf16.mxu0 %v4956_v0  ;;  %1601 = vmatpush1.bf16.msra.mxu1 %v4445_v59  ;;  %v4536_v59 = vld [vmem:[#allocation2 + $0x210] ss:$24 sps:$4 sm:$0xff]  }
  0x42   :  { %1602 = vmatprep.subr.bf16.mxu1 %v4956_v0 }
  0x44   :  { %1898 = vmatpush1.bf16.msra.mxu0 %v4342_v14  ;;  %v4467_v14 = vld [vmem:[#allocation2] ss:$24 sps:$4 sm:$0xff]  }
  0x45   :  { %1899 = vmatprep.subr.bf16.mxu0 %v4956_v0  ;;  %1603 = vmatpush1.bf16.msra.mxu1 %v4449_v62  ;;  %v4540_v62 = vld [vmem:[#allocation2 + $0x244] ss:$24 sps:$4 sm:$0xff]  }
  0x46   :  { %1604 = vmatprep.subr.bf16.mxu1 %v4956_v0 }
  0x48   :  { %1900 = vmatpush1.bf16.msra.mxu0 %v4343_v15  ;;  %v4469_v15 = vld [vmem:[#allocation2 + $0x4] ss:$24 sps:$4 sm:$0xff]  }
  0x49   :  { %1901 = vmatprep.subr.bf16.mxu0 %v4956_v0  ;;  %1605 = vmatpush1.bf16.msra.mxu1 %v4451_v1  ;;  %v4448_v1 = vld [vmem:[#allocation2 + $0x4e8] ss:$24 sps:$4 sm:$0xff]  }
  0x4a   :  { %1606 = vmatprep.subr.bf16.mxu1 %v4956_v0  ;;  %1616 = vmatprep.mubr.bf16.mxu1 %v4469_v15  ;;  %v4470_v15 = vld [vmem:[#allocation2 + $0x5ac] ss:$24 sps:$4 sm:$0xff]  }
  0x4c   :  { %1902 = vmatpush1.bf16.msra.mxu0 %v4344_v16  ;;  %v4397_v16 = vld [vmem:[#allocation2 + $0x2a8] ss:$24 sps:$4 sm:$0xff]  }
  0x4d   :  { %1903 = vmatprep.subr.bf16.mxu0 %v4956_v0  ;;  %1607 = vmatpush1.bf16.msra.mxu1 %v4455_v4  ;;  %v4548_v4 = vld [vmem:[#allocation2 + $0x270] ss:$24 sps:$4 sm:$0xff]  }
  0x4e   :  { %1608 = vmatprep.subr.bf16.mxu1 %v4956_v0 }
  0x50   :  { %1904 = vmatpush1.bf16.msra.mxu0 %v4345_v17  ;;  %v4399_v17 = vld [vmem:[#allocation2 + $0x2dc] ss:$24 sps:$4 sm:$0xff]  }
  0x51   :  { %2162 = vmatprep.subr.bf16.mxu0 %v4956_v0  ;;  %1609 = vmatpush1.bf16.msra.mxu1 %v4456_v5  ;;  %v4454_v5 = vld [vmem:[#allocation2 + $0x518] ss:$24 sps:$4 sm:$0xff]  }
  0x52   :  { %1610 = vmatprep.subr.bf16.mxu1 %v4956_v0 }
  0x53   :  { %1906 = vmatmul.mubr.bf16.vlgmr.msra.gmra.mrb[0].mxu0 %v4346_v18  ;;  %v4473_v18 = vld [vmem:[%s5939_s1 + $0x178] sm:$0xff]  }
  0x54   :  { %2163 = vmatpush1.bf16.msra.mxu0 %v4349_v19  ;;  %1913 = vmatprep.mubr.bf16.mxu0 %v4350_v20  ;;  %v4474_v19 = vld [vmem:[#allocation2 + $0x34] ss:$24 sps:$4 sm:$0xff]   ;;  %v4401_v20 = vld [vmem:[#allocation2 + $0x2d8] ss:$24 sps:$4 sm:$0xff]  }
  0x55   :  { %2164 = vmatprep.subr.bf16.mxu0 %v4956_v0  ;;  %1611 = vmatpush1.bf16.msra.mxu1 %v4460_v8  ;;  %v4554_v8 = vld [vmem:[#allocation2 + $0x2a0] ss:$24 sps:$4 sm:$0xff]  }
  0x56   :  { %1612 = vmatprep.subr.bf16.mxu1 %v4956_v0 }
  0x58   :  { %2165 = vmatpush1.bf16.msra.mxu0 %v4356_v21  ;;  %v4402_v21 = vld [vmem:[#allocation2 + $0x30c] ss:$24 sps:$4 sm:$0xff]  }
  0x59   :  { %2166 = vmatprep.subr.bf16.mxu0 %v4956_v0  ;;  %1613 = vmatpush1.bf16.msra.mxu1 %v4462_v10  ;;  %v4463_v10 = vld [vmem:[#allocation2 + $0x57c] ss:$24 sps:$4 sm:$0xff]  }
  0x5a   :  { %1614 = vmatprep.subr.bf16.mxu1 %v4956_v0 }
  0x5b   :  { %1914 = vmatmul.mubr.bf16.gmra.mrb[4].mxu0 %v4352_v22  ;;  %v4480_v22 = vld [vmem:[#allocation2 + $0x64] ss:$24 sps:$4 sm:$0xff]  }
  0x5c   :  { %1921 = vmatprep.mubr.bf16.mxu0 %v4353_v23  ;;  %2167 = vmatpush1.bf16.msra.mxu0 %v4363_v24  ;;  %v4482_v23 = vld [vmem:[#allocation2 + $0x60] ss:$24 sps:$4 sm:$0xff]  }
  0x5d   :  { %2168 = vmatprep.subr.bf16.mxu0 %v4956_v0  ;;  %1615 = vmatpush1.bf16.msra.mxu1 %v4466_v13  ;;  %v4404_v24 = vld [vmem:[#allocation2 + $0x308] ss:$24 sps:$4 sm:$0xff]  }
  0x5e   :  { %v4561_v13 = vld [vmem:[%s5941_s3] sm:$0xff]  }
  0x5f   :  { %3930 = vmatprep.subr.bf16.mxu1 %v4561_v13 }
  0x60   :  { %2169 = vmatpush1.bf16.msra.mxu0 %v4370_v25  ;;  %1617 = vmatmul.mubr.bf16.vlgmr.msra.gmra.mrb[0].mxu1 %v4467_v14  ;;  %v4406_v25 = vld [vmem:[#allocation2 + $0x33c] ss:$24 sps:$4 sm:$0xff]   ;;  %v4465_v14 = vld [vmem:[#allocation2 + $0x578] ss:$24 sps:$4 sm:$0xff]  }
  0x61   :  { %2170 = vmatprep.subr.bf16.mxu0 %v4956_v0  ;;  %1624 = vmatprep.mubr.bf16.mxu1 %v4474_v19  ;;  %v4477_v19 = vld [vmem:[#allocation2 + $0x5dc] ss:$24 sps:$4 sm:$0xff]  }
  0x62   :  { %3931 = vmatpush3.bf16.msra.mxu1 %v4561_v13 }
  0x63   :  { %1922 = vmatmul.mubr.bf16.gmra.mrb[8].mxu0 %v4355_v26  ;;  %v4486_v26 = vld [vmem:[#allocation2 + $0x94] ss:$24 sps:$4 sm:$0xff]  }
  0x64   :  { %1929 = vmatprep.mubr.bf16.mxu0 %v4357_v27  ;;  %2171 = vmatpush1.bf16.msra.mxu0 %v4377_v28  ;;  %v4488_v27 = vld [vmem:[#allocation2 + $0x90] ss:$24 sps:$4 sm:$0xff]  }
  0x65   :  { %2172 = vmatprep.subr.bf16.mxu0 %v4956_v0  ;;  %v4408_v28 = vld [vmem:[#allocation2 + $0x338] ss:$24 sps:$4 sm:$0xff]  }
  0x68   :  { %2173 = vmatpush1.bf16.msra.mxu0 %v4384_v29  ;;  %v4409_v29 = vld [vmem:[#allocation2 + $0x36c] ss:$24 sps:$4 sm:$0xff]  }
  0x69   :  { %2174 = vmatprep.subr.bf16.mxu0 %v4956_v0 }
  0x6b   :  { %1930 = vmatmul.mubr.bf16.gmra.mrb[12].mxu0 %v4359_v30  ;;  %v4492_v30 = vld [vmem:[#allocation2 + $0xc4] ss:$24 sps:$4 sm:$0xff]  }
  0x6c   :  { %1937 = vmatprep.mubr.bf16.mxu0 %v4360_v31  ;;  %2175 = vmatpush1.bf16.msra.mxu0 %v4391_v32  ;;  %v4494_v31 = vld [vmem:[#allocation2 + $0xc0] ss:$24 sps:$4 sm:$0xff]  }
  0x6d   :  { %2176 = vmatprep.subr.bf16.mxu0 %v4956_v0  ;;  %v4411_v32 = vld [vmem:[#allocation2 + $0x368] ss:$24 sps:$4 sm:$0xff]  }
  0x70   :  { %2177 = vmatpush1.bf16.msra.mxu0 %v4398_v33  ;;  %v4413_v33 = vld [vmem:[#allocation2 + $0x39c] ss:$24 sps:$4 sm:$0xff]  }
  0x71   :  { %2178 = vmatprep.subr.bf16.mxu0 %v4956_v0 }
  0x73   :  { %1938 = vmatmul.mubr.bf16.gmra.mrb[16].mxu0 %v4362_v34  ;;  %v4498_v34 = vld [vmem:[#allocation2 + $0xf4] ss:$24 sps:$4 sm:$0xff]  }
  0x74   :  { %1945 = vmatprep.mubr.bf16.mxu0 %v4364_v35  ;;  %2179 = vmatpush1.bf16.msra.mxu0 %v4405_v36  ;;  %v4500_v35 = vld [vmem:[#allocation2 + $0xf0] ss:$24 sps:$4 sm:$0xff]  }
  0x75   :  { %2180 = vmatprep.subr.bf16.mxu0 %v4956_v0  ;;  %v4415_v36 = vld [vmem:[#allocation2 + $0x398] ss:$24 sps:$4 sm:$0xff]  }
  0x78   :  { %2181 = vmatpush1.bf16.msra.mxu0 %v4412_v37  ;;  %v4416_v37 = vld [vmem:[#allocation2 + $0x3cc] ss:$24 sps:$4 sm:$0xff]  }
  0x79   :  { %2182 = vmatprep.subr.bf16.mxu0 %v4956_v0 }
  0x7b   :  { %1946 = vmatmul.mubr.bf16.gmra.mrb[20].mxu0 %v4366_v38  ;;  %v4504_v38 = vld [vmem:[#allocation2 + $0x124] ss:$24 sps:$4 sm:$0xff]  }
  0x7c   :  { %1953 = vmatprep.mubr.bf16.mxu0 %v4367_v39  ;;  %2183 = vmatpush1.bf16.msra.mxu0 %v4419_v40  ;;  %v4506_v39 = vld [vmem:[#allocation2 + $0x120] ss:$24 sps:$4 sm:$0xff]  }
  0x7d   :  { %2184 = vmatprep.subr.bf16.mxu0 %v4956_v0  ;;  %v4418_v40 = vld [vmem:[#allocation2 + $0x3c8] ss:$24 sps:$4 sm:$0xff]  }
  0x80   :  { %2185 = vmatpush1.bf16.msra.mxu0 %v4428_v45  ;;  %v4424_v45 = vld [vmem:[#allocation2 + $0x42c] ss:$24 sps:$4 sm:$0xff]  }
  0x81   :  { %2186 = vmatprep.subr.bf16.mxu0 %v4956_v0 }
  0x83   :  { %1954 = vmatmul.mubr.bf16.gmra.mrb[24].mxu0 %v4369_v42  ;;  %v4510_v42 = vld [vmem:[#allocation2 + $0x154] ss:$24 sps:$4 sm:$0xff]  }
  0x84   :  { %1961 = vmatprep.mubr.bf16.mxu0 %v4371_v43  ;;  %2187 = vmatpush1.bf16.msra.mxu0 %v4439_v54  ;;  %v4512_v43 = vld [vmem:[#allocation2 + $0x150] ss:$24 sps:$4 sm:$0xff]   ;;  %v4528_v54 = vld [vmem:[#allocation2 + $0x1e4] ss:$24 sps:$4 sm:$0xff]  }
  0x85   :  { %2188 = vmatprep.subr.bf16.mxu0 %v4956_v0 }
  0x88   :  { %2189 = vmatpush1.bf16.msra.mxu0 %v4450_v63  ;;  %v4542_v63 = vld [vmem:[#allocation2 + $0x240] ss:$24 sps:$4 sm:$0xff]  }
  0x89   :  { %2190 = vmatprep.subr.bf16.mxu0 %v4956_v0 }
  0x8b   :  { %1962 = vmatmul.mubr.bf16.gmra.mrb[28].mxu0 %v4373_v47  ;;  %v4518_v47 = vld [vmem:[#allocation2 + $0x180] ss:$24 sps:$4 sm:$0xff]  }
  0x8c   :  { %1969 = vmatprep.mubr.bf16.mxu0 %v4374_v48  ;;  %2191 = vmatpush1.bf16.msra.mxu0 %v4461_v9  ;;  %v4426_v48 = vld [vmem:[#allocation2 + $0x428] ss:$24 sps:$4 sm:$0xff]  }
  0x8d   :  { %2192 = vmatprep.subr.bf16.mxu0 %v4956_v0  ;;  %v4476_v0 = vld [vmem:[#allocation2 + $0x30] ss:$24 sps:$4 sm:$0xff]  }
  0x8e   :  { %1625 = vmatmul.mubr.bf16.gmra.mrb[4].mxu1 %v4476_v0  ;;  %v4459_v9 = vld [vmem:[#allocation2 + $0x548] ss:$24 sps:$4 sm:$0xff]   ;;  %v4571_v0 = vld [vmem:[#allocation2 + $0x334] ss:$24 sps:$4 sm:$0xff]  }
  0x8f   :  { %1632 = vmatprep.mubr.bf16.mxu1 %v4480_v22  ;;  %v4485_v22 = vld [vmem:[#allocation2 + $0x14] ss:$24 sps:$4 sm:$0xff]  }
  0x90   :  { %2193 = vmatpush1.bf16.msra.mxu0 %v4473_v18  ;;  %v4472_v18 = vld [vmem:[#allocation2 + $0x5a8] ss:$24 sps:$4 sm:$0xff]  }
  0x93   :  { %1970 = vmatmul.mubr.bf16.gmra.mrb[32].mxu0 %v4376_v51  ;;  %v4524_v51 = vld [vmem:[#allocation2 + $0x1b0] ss:$24 sps:$4 sm:$0xff]  }
  0x94   :  { %1977 = vmatprep.mubr.bf16.mxu0 %v4378_v52  ;;  %v4432_v52 = vld [vmem:[#allocation2 + $0x458] ss:$24 sps:$4 sm:$0xff]  }
  0x96   :  { %1633 = vmatmul.mubr.bf16.gmra.mrb[8].mxu1 %v4482_v23  ;;  %v4577_v23 = vld [vmem:[#allocation2 + $0x364] ss:$24 sps:$4 sm:$0xff]  }
  0x97   :  { %1640 = vmatprep.mubr.bf16.mxu1 %v4486_v26  ;;  %v4489_v26 = vld [vmem:[#allocation2 + $0x44] ss:$24 sps:$4 sm:$0xff]  }
  0x9b   :  { %1978 = vmatmul.mubr.bf16.gmra.mrb[36].mxu0 %v4380_v56  ;;  %v4437_v56 = vld [vmem:[#allocation2 + $0x488] ss:$24 sps:$4 sm:$0xff]  }
  0x9c   :  { %1985 = vmatprep.mubr.bf16.mxu0 %v4381_v57  ;;  %v4441_v57 = vld [vmem:[#allocation2 + $0x4bc] ss:$24 sps:$4 sm:$0xff]  }
  0x9e   :  { %1641 = vmatmul.mubr.bf16.gmra.mrb[12].mxu1 %v4488_v27  ;;  %v4583_v27 = vld [vmem:[#allocation2 + $0x394] ss:$24 sps:$4 sm:$0xff]  }
  0x9f   :  { %1648 = vmatprep.mubr.bf16.mxu1 %v4492_v30  ;;  %v4495_v30 = vld [vmem:[#allocation2 + $0x74] ss:$24 sps:$4 sm:$0xff]  }
  0xa3   :  { %1986 = vmatmul.mubr.bf16.gmra.mrb[40].mxu0 %v4383_v60  ;;  %v4443_v60 = vld [vmem:[#allocation2 + $0x4b8] ss:$24 sps:$4 sm:$0xff]  }
  0xa4   :  { %1993 = vmatprep.mubr.bf16.mxu0 %v4385_v61  ;;  %v4446_v61 = vld [vmem:[#allocation2 + $0x4ec] ss:$24 sps:$4 sm:$0xff]  }
  0xa6   :  { %1649 = vmatmul.mubr.bf16.gmra.mrb[16].mxu1 %v4494_v31  ;;  %v4589_v31 = vld [vmem:[#allocation2 + $0x3c4] ss:$24 sps:$4 sm:$0xff]  }
  0xa7   :  { %1656 = vmatprep.mubr.bf16.mxu1 %v4498_v34  ;;  %v4501_v34 = vld [vmem:[#allocation2 + $0xa4] ss:$24 sps:$4 sm:$0xff]  }
  0xab   :  { %1994 = vmatmul.mubr.bf16.gmra.mrb[44].mxu0 %v4387_v2  ;;  %v4452_v2 = vld [vmem:[#allocation2 + $0x51c] ss:$24 sps:$4 sm:$0xff]  }
  0xac   :  { %2001 = vmatprep.mubr.bf16.mxu0 %v4388_v3  ;;  %v4546_v3 = vld [vmem:[#allocation2 + $0x274] ss:$24 sps:$4 sm:$0xff]  }
  0xae   :  { %1657 = vmatmul.mubr.bf16.gmra.mrb[20].mxu1 %v4500_v35  ;;  %v4595_v35 = vld [vmem:[#allocation2 + $0x3f4] ss:$24 sps:$4 sm:$0xff]  }
  0xaf   :  { %1664 = vmatprep.mubr.bf16.mxu1 %v4504_v38  ;;  %v4507_v38 = vld [vmem:[#allocation2 + $0xd4] ss:$24 sps:$4 sm:$0xff]  }
  0xb3   :  { %2002 = vmatmul.mubr.bf16.gmra.mrb[48].mxu0 %v4390_v6  ;;  %v4457_v6 = vld [vmem:[#allocation2 + $0x54c] ss:$24 sps:$4 sm:$0xff]  }
  0xb4   :  { %2009 = vmatprep.mubr.bf16.mxu0 %v4392_v7  ;;  %v4552_v7 = vld [vmem:[#allocation2 + $0x2a4] ss:$24 sps:$4 sm:$0xff]  }
  0xb6   :  { %1665 = vmatmul.mubr.bf16.gmra.mrb[24].mxu1 %v4506_v39  ;;  %v4601_v39 = vld [vmem:[#allocation2 + $0x424] ss:$24 sps:$4 sm:$0xff]  }
  0xb7   :  { %1672 = vmatprep.mubr.bf16.mxu1 %v4510_v42  ;;  %v4513_v42 = vld [vmem:[#allocation2 + $0x104] ss:$24 sps:$4 sm:$0xff]  }
  0xbb   :  { %2010 = vmatmul.mubr.bf16.gmra.mrb[52].mxu0 %v4394_v11  ;;  %v4558_v11 = vld [vmem:[#allocation2 + $0x2d4] ss:$24 sps:$4 sm:$0xff]  }
  0xbc   :  { %2017 = vmatprep.mubr.bf16.mxu0 %v4395_v12  ;;  %v4560_v12 = vld [vmem:[#allocation2 + $0x2d0] ss:$24 sps:$4 sm:$0xff]  }
  0xbe   :  { %1673 = vmatmul.mubr.bf16.gmra.mrb[28].mxu1 %v4512_v43  ;;  %v4607_v43 = vld [vmem:[#allocation2 + $0x454] ss:$24 sps:$4 sm:$0xff]  }
  0xbf   :  { %1680 = vmatprep.mubr.bf16.mxu1 %v4516_v46  ;;  %v4515_v46 = vld [vmem:[#allocation2 + $0x100] ss:$24 sps:$4 sm:$0xff]  }
  0xc3   :  { %2018 = vmatmul.mubr.bf16.gmra.mrb[56].mxu0 %v4397_v16  ;;  %v4565_v16 = vld [vmem:[#allocation2 + $0x304] ss:$24 sps:$4 sm:$0xff]  }
  0xc4   :  { %2025 = vmatprep.mubr.bf16.mxu0 %v4399_v17  ;;  %v4567_v17 = vld [vmem:[#allocation2 + $0x300] ss:$24 sps:$4 sm:$0xff]  }
  0xc6   :  { %1681 = vmatmul.mubr.bf16.gmra.mrb[32].mxu1 %v4518_v47  ;;  %v4519_v47 = vld [vmem:[#allocation2 + $0x134] ss:$24 sps:$4 sm:$0xff]  }
  0xc7   :  { %1688 = vmatprep.mubr.bf16.mxu1 %v4522_v50  ;;  %v4521_v50 = vld [vmem:[#allocation2 + $0x130] ss:$24 sps:$4 sm:$0xff]  }
  0xcb   :  { %2026 = vmatmul.mubr.bf16.gmra.mrb[60].mxu0 %v4401_v20  ;;  %v4573_v20 = vld [vmem:[#allocation2 + $0x330] ss:$24 sps:$4 sm:$0xff]  }
  0xcc   :  { %2033 = vmatprep.mubr.bf16.mxu0 %v4402_v21  ;;  %v4479_v21 = vld [vmem:[#allocation2 + $0x5d8] ss:$24 sps:$4 sm:$0xff]  }
  0xce   :  { %1689 = vmatmul.mubr.bf16.gmra.mrb[36].mxu1 %v4524_v51  ;;  %v4525_v51 = vld [vmem:[#allocation2 + $0x164] ss:$24 sps:$4 sm:$0xff]  }
  0xcf   :  { %1696 = vmatprep.mubr.bf16.mxu1 %v4528_v54  ;;  %v4527_v54 = vld [vmem:[#allocation2 + $0x160] ss:$24 sps:$4 sm:$0xff]  }
  0xd3   :  { %2034 = vmatmul.mubr.bf16.gmra.mrb[64].mxu0 %v4404_v24  ;;  %v4579_v24 = vld [vmem:[#allocation2 + $0x360] ss:$24 sps:$4 sm:$0xff]  }
  0xd4   :  { %2041 = vmatprep.mubr.bf16.mxu0 %v4406_v25  ;;  %v4483_v25 = vld [vmem:[#allocation2 + $0x10] ss:$24 sps:$4 sm:$0xff]  }
  0xd6   :  { %1697 = vmatmul.mubr.bf16.gmra.mrb[40].mxu1 %v4530_v55  ;;  %v4531_v55 = vld [vmem:[#allocation2 + $0x194] ss:$24 sps:$4 sm:$0xff]  }
  0xd7   :  { %1704 = vmatprep.mubr.bf16.mxu1 %v4534_v58  ;;  %v4533_v58 = vld [vmem:[#allocation2 + $0x190] ss:$24 sps:$4 sm:$0xff]  }
  0xdb   :  { %2042 = vmatmul.mubr.bf16.gmra.mrb[68].mxu0 %v4408_v28  ;;  %v4585_v28 = vld [vmem:[#allocation2 + $0x390] ss:$24 sps:$4 sm:$0xff]  }
  0xdc   :  { %2049 = vmatprep.mubr.bf16.mxu0 %v4409_v29  ;;  %v4491_v29 = vld [vmem:[#allocation2 + $0x40] ss:$24 sps:$4 sm:$0xff]  }
  0xde   :  { %1705 = vmatmul.mubr.bf16.gmra.mrb[44].mxu1 %v4536_v59  ;;  %v4537_v59 = vld [vmem:[#allocation2 + $0x1c4] ss:$24 sps:$4 sm:$0xff]  }
  0xdf   :  { %1712 = vmatprep.mubr.bf16.mxu1 %v4540_v62  ;;  %v4539_v62 = vld [vmem:[#allocation2 + $0x1c0] ss:$24 sps:$4 sm:$0xff]  }
  0xe3   :  { %2050 = vmatmul.mubr.bf16.gmra.mrb[72].mxu0 %v4411_v32  ;;  %v4591_v32 = vld [vmem:[#allocation2 + $0x3c0] ss:$24 sps:$4 sm:$0xff]  }
  0xe4   :  { %2057 = vmatprep.mubr.bf16.mxu0 %v4413_v33  ;;  %v4497_v33 = vld [vmem:[#allocation2 + $0x70] ss:$24 sps:$4 sm:$0xff]  }
  0xe6   :  { %1713 = vmatmul.mubr.bf16.gmra.mrb[48].mxu1 %v4542_v63  ;;  %v4543_v63 = vld [vmem:[#allocation2 + $0x1f4] ss:$24 sps:$4 sm:$0xff]  }
  0xe7   :  { %1720 = vmatprep.mubr.bf16.mxu1 %v4546_v3 }
  0xeb   :  { %2058 = vmatmul.mubr.bf16.gmra.mrb[76].mxu0 %v4415_v36  ;;  %v4597_v36 = vld [vmem:[#allocation2 + $0x3f0] ss:$24 sps:$4 sm:$0xff]  }
  0xec   :  { %2065 = vmatprep.mubr.bf16.mxu0 %v4416_v37  ;;  %v4503_v37 = vld [vmem:[#allocation2 + $0xa0] ss:$24 sps:$4 sm:$0xff]  }
  0xee   :  { %1721 = vmatmul.mubr.bf16.gmra.mrb[52].mxu1 %v4548_v4 }
  0xef   :  { %1728 = vmatprep.mubr.bf16.mxu1 %v4552_v7 }
  0xf3   :  { %2066 = vmatmul.mubr.bf16.gmra.mrb[80].mxu0 %v4418_v40  ;;  %v4603_v40 = vld [vmem:[#allocation2 + $0x420] ss:$24 sps:$4 sm:$0xff]  }
  0xf4   :  { %2073 = vmatprep.mubr.bf16.mxu0 %v4420_v41  ;;  %v4509_v41 = vld [vmem:[#allocation2 + $0xd0] ss:$24 sps:$4 sm:$0xff]  }
  0xf6   :  { %1729 = vmatmul.mubr.bf16.gmra.mrb[56].mxu1 %v4554_v8  ;;  %v4644_v8 = vld [vmem:[#allocation2 + $0x574] ss:$24 sps:$4 sm:$0xff]  }
  0xf7   :  { %1736 = vmatprep.mubr.bf16.mxu1 %v4558_v11  ;;  %v4551_v11 = vld [vmem:[#allocation2 + $0x220] ss:$24 sps:$4 sm:$0xff]  }
  0xfb   :  { %2074 = vmatmul.mubr.bf16.gmra.mrb[84].mxu0 %v4422_v44  ;;  %v4609_v44 = vld [vmem:[#allocation2 + $0x450] ss:$24 sps:$4 sm:$0xff]  }
  0xfc   :  { %2081 = vmatprep.mubr.bf16.mxu0 %v4424_v45  ;;  %v4610_v45 = vld [vmem:[%s5941_s3 + $0x8] sm:$0xff]  }
  0xfd   :  { %3932 = vmatprep.subr.bf16.mxu1 %v4610_v45 }
  0xfe   :  { %1737 = vmatmul.mubr.bf16.gmra.mrb[60].mxu1 %v4560_v12  ;;  %v4555_v12 = vld [vmem:[#allocation2 + $0x254] ss:$24 sps:$4 sm:$0xff]  }
  0xff   :  { %1744 = vmatprep.mubr.bf16.mxu1 %v4565_v16  ;;  %3933 = vmatpush3.bf16.msra.mxu1 %v4610_v45  ;;  %v4650_v16 = vld [vmem:[#allocation2 + $0x5a4] ss:$24 sps:$4 sm:$0xff]  }
 0x103   :  { %2082 = vmatmul.mubr.bf16.gmra.mrb[88].mxu0 %v4426_v48  ;;  %v4614_v48 = vld [vmem:[#allocation2 + $0x484] ss:$24 sps:$4 sm:$0xff]  }
 0x104   :  { %2089 = vmatprep.mubr.bf16.mxu0 %v4430_v49  ;;  %v4616_v49 = vld [vmem:[#allocation2 + $0x480] ss:$24 sps:$4 sm:$0xff]  }
 0x106   :  { %1745 = vmatmul.mubr.bf16.gmra.mrb[64].mxu1 %v4567_v17 }
 0x107   :  { %1752 = vmatprep.mubr.bf16.mxu1 %v4571_v0  ;;  %v4562_v0 = vld [vmem:[#allocation2 + $0x284] ss:$24 sps:$4 sm:$0xff]  }
 0x10b   :  { %2090 = vmatmul.mubr.bf16.gmra.mrb[92].mxu0 %v4432_v52  ;;  %v4620_v52 = vld [vmem:[#allocation2 + $0x4b4] ss:$24 sps:$4 sm:$0xff]  }
 0x10c   :  { %2097 = vmatprep.mubr.bf16.mxu0 %v4435_v53  ;;  %v4622_v53 = vld [vmem:[#allocation2 + $0x4b0] ss:$24 sps:$4 sm:$0xff]  }
 0x10e   :  { %1753 = vmatmul.mubr.bf16.gmra.mrb[68].mxu1 %v4573_v20 }
 0x10f   :  { %1760 = vmatprep.mubr.bf16.mxu1 %v4577_v23 }
 0x113   :  { %2098 = vmatmul.mubr.bf16.gmra.mrb[96].mxu0 %v4437_v56  ;;  %v4626_v56 = vld [vmem:[#allocation2 + $0x4e4] ss:$24 sps:$4 sm:$0xff]  }
 0x114   :  { %2105 = vmatprep.mubr.bf16.mxu0 %v4441_v57  ;;  %v4628_v57 = vld [vmem:[#allocation2 + $0x4e0] ss:$24 sps:$4 sm:$0xff]  }
 0x116   :  { %1761 = vmatmul.mubr.bf16.gmra.mrb[72].mxu1 %v4579_v24  ;;  %v4656_v24 = vld [vmem:[#allocation2 + $0x5d4] ss:$24 sps:$4 sm:$0xff]  }
 0x117   :  { %1768 = vmatprep.mubr.bf16.mxu1 %v4583_v27  ;;  %v4564_v27 = vld [vmem:[#allocation2 + $0x280] ss:$24 sps:$4 sm:$0xff]  }
 0x11b   :  { %2106 = vmatmul.mubr.bf16.gmra.mrb[100].mxu0 %v4443_v60  ;;  %v4632_v60 = vld [vmem:[#allocation2 + $0x514] ss:$24 sps:$4 sm:$0xff]  }
 0x11c   :  { %2113 = vmatprep.mubr.bf16.mxu0 %v4446_v61  ;;  %v4634_v61 = vld [vmem:[#allocation2 + $0x510] ss:$24 sps:$4 sm:$0xff]  }
 0x11e   :  { %1769 = vmatmul.mubr.bf16.gmra.mrb[76].mxu1 %v4585_v28  ;;  %v4568_v28 = vld [vmem:[#allocation2 + $0x2b4] ss:$24 sps:$4 sm:$0xff]  }
 0x11f   :  { %1776 = vmatprep.mubr.bf16.mxu1 %v4589_v31  ;;  %v4663_v31 = vld [vmem:[%s5941_s3 + $0x18] sm:$0xff]  }
 0x123   :  { %2114 = vmatmul.mubr.bf16.gmra.mrb[104].mxu0 %v4448_v1  ;;  %v4638_v1 = vld [vmem:[#allocation2 + $0x544] ss:$24 sps:$4 sm:$0xff]  }
 0x124   :  { %2121 = vmatprep.mubr.bf16.mxu0 %v4452_v2  ;;  %v4640_v2 = vld [vmem:[#allocation2 + $0x540] ss:$24 sps:$4 sm:$0xff]  }
 0x126   :  { %1777 = vmatmul.mubr.bf16.gmra.mrb[80].mxu1 %v4591_v32 }
 0x127   :  { %1784 = vmatprep.mubr.bf16.mxu1 %v4595_v35  ;;  %v4574_v35 = vld [vmem:[#allocation2 + $0x2e4] ss:$24 sps:$4 sm:$0xff]  }
 0x12b   :  { %2122 = vmatmul.mubr.bf16.gmra.mrb[108].mxu0 %v4454_v5  ;;  %v4545_v5 = vld [vmem:[#allocation2 + $0x1f0] ss:$24 sps:$4 sm:$0xff]  }
 0x12c   :  { %2129 = vmatprep.mubr.bf16.mxu0 %v4457_v6  ;;  %v4549_v6 = vld [vmem:[#allocation2 + $0x224] ss:$24 sps:$4 sm:$0xff]  }
 0x12e   :  { %1785 = vmatmul.mubr.bf16.gmra.mrb[84].mxu1 %v4597_v36 }
 0x12f   :  { %1792 = vmatprep.mubr.bf16.mxu1 %v4601_v39 }
 0x133   :  { %2130 = vmatmul.mubr.bf16.gmra.mrb[112].mxu0 %v4459_v9  ;;  %v5207_v3 = vpop.f32.mrb[0].mxu1 }
 0x134   :  { %2137 = vmatprep.mubr.bf16.mxu0 %v4463_v10  ;;  %v1620_v4 = vpop.f32.mrb[1].mxu1  ;;  %v4646_v10 = vld [vmem:[#allocation2 + $0x570] ss:$24 sps:$4 sm:$0xff]  }
 0x135   :  { %v5209_v7 = vpop.f32.mrb[2].mxu1 }
 0x136   :  { %1793 = vmatmul.mubr.bf16.gmra.mrb[88].mxu1 %v4603_v40  ;;  %v1623_v9 = vpop.f32.mrb[3].mxu1  ;;  %v4576_v40 = vld [vmem:[#allocation2 + $0x2e0] ss:$24 sps:$4 sm:$0xff]  }
 0x137   :  { %1800 = vmatprep.mubr.bf16.mxu1 %v4607_v43  ;;  %v4606_v9 = vld [vmem:[#allocation2 + $0x3d0] ss:$24 sps:$4 sm:$0xff]  }
 0x13b   :  { %2138 = vmatmul.mubr.bf16.gmra.mrb[116].mxu0 %v4465_v14 }
 0x13c   :  { %2145 = vmatprep.mubr.bf16.mxu0 %v4470_v15 }
 0x13e   :  { %1801 = vmatmul.mubr.bf16.gmra.mrb[92].mxu1 %v4609_v44 }
 0x13f   :  { %1808 = vmatprep.mubr.bf16.mxu1 %v4614_v48 }
 0x143   :  { %2146 = vmatmul.mubr.bf16.gmra.mrb[120].mxu0 %v4472_v18  ;;  %v4652_v18 = vld [vmem:[#allocation2 + $0x5a0] ss:$24 sps:$4 sm:$0xff]  }
 0x144   :  { %2153 = vmatprep.mubr.bf16.mxu0 %v4477_v19  ;;  %v4557_v19 = vld [vmem:[#allocation2 + $0x250] ss:$24 sps:$4 sm:$0xff]  }
 0x146   :  { %1809 = vmatmul.mubr.bf16.gmra.mrb[96].mxu1 %v4616_v49 }
 0x147   :  { %1816 = vmatprep.mubr.bf16.mxu1 %v4620_v52  ;;  %v4588_v52 = vld [vmem:[#allocation2 + $0x340] ss:$24 sps:$4 sm:$0xff]  }
 0x14b   :  { %2154 = vmatmul.mubr.bf16.gmra.mrb[124].mxu0 %v4479_v21 }
 0x14c   :  { %2194 = vmatprep.mubr.bf16.mxu0 %v4485_v22 }
 0x14e   :  { %1817 = vmatmul.mubr.bf16.gmra.mrb[100].mxu1 %v4622_v53  ;;  %v4592_v53 = vld [vmem:[#allocation2 + $0x374] ss:$24 sps:$4 sm:$0xff]  }
 0x14f   :  { %1824 = vmatprep.mubr.bf16.mxu1 %v4626_v56 }
 0x153   :  { %2195 = vmatmul.mubr.bf16.vlgmr.msra.gmra.mrb[0].mxu0 %v4483_v25  ;;  %v4658_v25 = vld [vmem:[#allocation2 + $0x5d0] ss:$24 sps:$4 sm:$0xff]  }
 0x154   :  { %2202 = vmatprep.mubr.bf16.mxu0 %v4489_v26  ;;  %v4659_v26 = vld [vmem:[%s5941_s3 + $0x10] sm:$0xff]  }
 0x155   :  { %3934 = vmatprep.subr.bf16.mxu1 %v4659_v26 }
 0x156   :  { %1825 = vmatmul.mubr.bf16.gmra.mrb[104].mxu1 %v4628_v57 }
 0x157   :  { %1832 = vmatprep.mubr.bf16.mxu1 %v4632_v60  ;;  %3935 = vmatpush3.bf16.msra.mxu1 %v4659_v26 }
 0x158   :  { %3936 = vmatprep.subr.bf16.mxu1 %v4663_v31 }
 0x15b   :  { %2203 = vmatmul.mubr.bf16.gmra.mrb[4].mxu0 %v4491_v29  ;;  %3937 = vmatpush3.bf16.msra.mxu1 %v4663_v31  ;;  %v4625_v31 = vld [vmem:[#allocation2 + $0x460] ss:$24 sps:$4 sm:$0xff]  }
 0x15c   :  { %2210 = vmatprep.mubr.bf16.mxu0 %v4495_v30 }
 0x15e   :  { %1833 = vmatmul.mubr.bf16.gmra.mrb[108].mxu1 %v4634_v61 }
 0x15f   :  { %1840 = vmatprep.mubr.bf16.mxu1 %v4638_v1  ;;  %v4600_v1 = vld [vmem:[#allocation2 + $0x3a0] ss:$24 sps:$4 sm:$0xff]  }
 0x161   :  { %v5211_v13 = vpop.f32.mrb[4].mxu1 }
 0x162   :  { %v1628_v14 = vpop.f32.mrb[5].mxu1 }
 0x163   :  { %2211 = vmatmul.mubr.bf16.gmra.mrb[8].mxu0 %v4497_v33  ;;  %v5213_v15 = vpop.f32.mrb[6].mxu1 }
 0x164   :  { %2218 = vmatprep.mubr.bf16.mxu0 %v4501_v34  ;;  %v1631_v17 = vpop.f32.mrb[7].mxu1  ;;  %v4570_v34 = vld [vmem:[#allocation2 + $0x2b0] ss:$24 sps:$4 sm:$0xff]  }
 0x165   :  { %v4613_v17 = vld [vmem:[#allocation2 + $0x400] ss:$24 sps:$4 sm:$0xff]  }
 0x166   :  { %1841 = vmatmul.mubr.bf16.gmra.mrb[112].mxu1 %v4640_v2  ;;  %v4604_v2 = vld [vmem:[#allocation2 + $0x3d4] ss:$24 sps:$4 sm:$0xff]  }
 0x167   :  { %1848 = vmatprep.mubr.bf16.mxu1 %v4644_v8 }
 0x169   :  { %v5215_v20 = vpop.f32.mrb[8].mxu1 }
 0x16a   :  { %v1636_v21 = vpop.f32.mrb[9].mxu1 }
 0x16b   :  { %2219 = vmatmul.mubr.bf16.gmra.mrb[12].mxu0 %v4503_v37  ;;  %v5217_v22 = vpop.f32.mrb[10].mxu1 }
 0x16c   :  { %2226 = vmatprep.mubr.bf16.mxu0 %v4507_v38  ;;  %v1639_v23 = vpop.f32.mrb[11].mxu1 }
 0x16e   :  { %1849 = vmatmul.mubr.bf16.gmra.mrb[116].mxu1 %v4646_v10  ;;  %v4611_v10 = vld [vmem:[#allocation2 + $0x404] ss:$24 sps:$4 sm:$0xff]  }
 0x16f   :  { %1856 = vmatprep.mubr.bf16.mxu1 %v4650_v16 }
 0x171   :  { %v5222_v29 = vpop.f32.mrb[12].mxu1 }
 0x172   :  { %v1644_v30 = vpop.f32.mrb[13].mxu1 }
 0x173   :  { %2227 = vmatmul.mubr.bf16.gmra.mrb[16].mxu0 %v4509_v41  ;;  %v5227_v32 = vpop.f32.mrb[14].mxu1  ;;  %v4580_v41 = vld [vmem:[#allocation2 + $0x314] ss:$24 sps:$4 sm:$0xff]  }
 0x174   :  { %2234 = vmatprep.mubr.bf16.mxu0 %v4513_v42  ;;  %v1647_v33 = vpop.f32.mrb[15].mxu1 }
 0x175   :  { %v4629_v33 = vld [vmem:[#allocation2 + $0x494] ss:$24 sps:$4 sm:$0xff]  }
 0x176   :  { %1857 = vmatmul.mubr.bf16.gmra.mrb[120].mxu1 %v4652_v18  ;;  %v4617_v18 = vld [vmem:[#allocation2 + $0x434] ss:$24 sps:$4 sm:$0xff]  }
 0x177   :  { %1864 = vmatprep.mubr.bf16.mxu1 %v4656_v24  ;;  %v4619_v24 = vld [vmem:[#allocation2 + $0x430] ss:$24 sps:$4 sm:$0xff]  }
 0x179   :  { %v5229_v36 = vpop.f32.mrb[16].mxu1 }
 0x17a   :  { %v1652_v37 = vpop.f32.mrb[17].mxu1 }
 0x17b   :  { %2235 = vmatmul.mubr.bf16.gmra.mrb[20].mxu0 %v4515_v46  ;;  %v5231_v38 = vpop.f32.mrb[18].mxu1  ;;  %v4582_v46 = vld [vmem:[#allocation2 + $0x310] ss:$24 sps:$4 sm:$0xff]  }
 0x17c   :  { %2242 = vmatprep.mubr.bf16.mxu0 %v4519_v47  ;;  %v1655_v39 = vpop.f32.mrb[19].mxu1  ;;  %v4586_v47 = vld [vmem:[#allocation2 + $0x344] ss:$24 sps:$4 sm:$0xff]  }
 0x17e   :  { %1865 = vmatmul.mubr.bf16.gmra.mrb[124].mxu1 %v4658_v25  ;;  %v4623_v25 = vld [vmem:[#allocation2 + $0x464] ss:$24 sps:$4 sm:$0xff]  }
 0x181   :  { %v5233_v42 = vpop.f32.mrb[20].mxu1 }
 0x182   :  { %v1660_v43 = vpop.f32.mrb[21].mxu1 }
 0x183   :  { %2243 = vmatmul.mubr.bf16.gmra.mrb[24].mxu0 %v4521_v50  ;;  %v5235_v44 = vpop.f32.mrb[22].mxu1 }
 0x184   :  { %2250 = vmatprep.mubr.bf16.mxu0 %v4525_v51  ;;  %v1663_v45 = vpop.f32.mrb[23].mxu1 }
 0x189   :  { %v5237_v48 = vpop.f32.mrb[24].mxu1 }
 0x18a   :  { %v1668_v49 = vpop.f32.mrb[25].mxu1 }
 0x18b   :  { %2251 = vmatmul.mubr.bf16.gmra.mrb[28].mxu0 %v4527_v54  ;;  %v5239_v50 = vpop.f32.mrb[26].mxu1  ;;  %v4637_v49 = vld [vmem:[#allocation2 + $0x4c0] ss:$24 sps:$4 sm:$0xff]  }
 0x18c   :  { %2258 = vmatprep.mubr.bf16.mxu0 %v4531_v55  ;;  %v1671_v51 = vpop.f32.mrb[27].mxu1 }
 0x18d   :  { %v4641_v51 = vld [vmem:[#allocation2 + $0x4f4] ss:$24 sps:$4 sm:$0xff]  }
 0x191   :  { %v5241_v54 = vpop.f32.mrb[28].mxu1 }
 0x192   :  { %v1676_v55 = vpop.f32.mrb[29].mxu1 }
 0x193   :  { %2259 = vmatmul.mubr.bf16.gmra.mrb[32].mxu0 %v4533_v58  ;;  %v5243_v56 = vpop.f32.mrb[30].mxu1  ;;  %v4594_v58 = vld [vmem:[#allocation2 + $0x370] ss:$24 sps:$4 sm:$0xff]  }
 0x194   :  { %2266 = vmatprep.mubr.bf16.mxu0 %v4537_v59  ;;  %v1679_v57 = vpop.f32.mrb[31].mxu1  ;;  %v4598_v59 = vld [vmem:[#allocation2 + $0x3a4] ss:$24 sps:$4 sm:$0xff]  }
 0x199   :  { %v5245_v60 = vpop.f32.mrb[32].mxu1 }
 0x19a   :  { %v1684_v61 = vpop.f32.mrb[33].mxu1 }
 0x19b   :  { %2267 = vmatmul.mubr.bf16.gmra.mrb[36].mxu0 %v4539_v62  ;;  %v5247_v62 = vpop.f32.mrb[34].mxu1  ;;  %v4647_v61 = vld [vmem:[#allocation2 + $0x524] ss:$24 sps:$4 sm:$0xff]  }
 0x19c   :  { %2274 = vmatprep.mubr.bf16.mxu0 %v4543_v63  ;;  %v1687_v63 = vpop.f32.mrb[35].mxu1 }
 0x1a1   :  { %v5249_v4 = vpop.f32.mrb[36].mxu1 }
 0x1a3   :  { %2275 = vmatmul.mubr.bf16.gmra.mrb[40].mxu0 %v4545_v5  ;;  %v1692_v5 = vpop.f32.mrb[37].mxu1 }
 0x1a4   :  { %2282 = vmatprep.mubr.bf16.mxu0 %v4549_v6  ;;  %v5251_v6 = vpop.f32.mrb[38].mxu1 }
 0x1a5   :  { %v1695_v8 = vpop.f32.mrb[39].mxu1 }
 0x1ab   :  { %2283 = vmatmul.mubr.bf16.gmra.mrb[44].mxu0 %v4551_v11  ;;  %v5253_v11 = vpop.f32.mrb[40].mxu1 }
 0x1ac   :  { %2290 = vmatprep.mubr.bf16.mxu0 %v4555_v12  ;;  %v1700_v12 = vpop.f32.mrb[41].mxu1 }
 0x1ad   :  { %v5255_v14 = vpop.f32.mrb[42].mxu1 }
 0x1ae   :  { %v1703_v16 = vpop.f32.mrb[43].mxu1 }
 0x1b3   :  { %2291 = vmatmul.mubr.bf16.gmra.mrb[48].mxu0 %v4557_v19  ;;  %v5257_v19 = vpop.f32.mrb[44].mxu1 }
 0x1b4   :  { %2298 = vmatprep.mubr.bf16.mxu0 %v4562_v0  ;;  %v1708_v0 = vpop.f32.mrb[45].mxu1 }
 0x1b5   :  { %v5259_v21 = vpop.f32.mrb[46].mxu1  ;;  %v4653_v0 = vld [vmem:[#allocation2 + $0x554] ss:$24 sps:$4 sm:$0xff]  }
 0x1b6   :  { %v1711_v23 = vpop.f32.mrb[47].mxu1 }
 0x1b9   :  { %v5261_v26 = vpop.f32.mrb[48].mxu1 }
 0x1bb   :  { %2299 = vmatmul.mubr.bf16.gmra.mrb[52].mxu0 %v4564_v27  ;;  %v1716_v27 = vpop.f32.mrb[49].mxu1 }
 0x1bc   :  { %2306 = vmatprep.mubr.bf16.mxu0 %v4568_v28  ;;  %v5263_v28 = vpop.f32.mrb[50].mxu1 }
 0x1bd   :  { %v1719_v30 = vpop.f32.mrb[51].mxu1 }
 0x1c3   :  { %2307 = vmatmul.mubr.bf16.gmra.mrb[56].mxu0 %v4570_v34  ;;  %v5265_v34 = vpop.f32.mrb[52].mxu1 }
 0x1c4   :  { %2314 = vmatprep.mubr.bf16.mxu0 %v4574_v35  ;;  %v1724_v35 = vpop.f32.mrb[53].mxu1 }
 0x1c5   :  { %v5267_v37 = vpop.f32.mrb[54].mxu1 }
 0x1c6   :  { %v1727_v39 = vpop.f32.mrb[55].mxu1 }
 0x1c9   :  { %v5269_v43 = vpop.f32.mrb[56].mxu1 }
 0x1ca   :  { %v1732_v45 = vpop.f32.mrb[57].mxu1 }
 0x1cb   :  { %2315 = vmatmul.mubr.bf16.gmra.mrb[60].mxu0 %v4576_v40  ;;  %v4631_v40 = vld [vmem:[#allocation2 + $0x490] ss:$24 sps:$4 sm:$0xff]   ;;  %v4660_v45 = vld [vmem:[#allocation2 + $0x584] ss:$24 sps:$4 sm:$0xff]  }
 0x1cc   :  { %2322 = vmatprep.mubr.bf16.mxu0 %v4580_v41  ;;  %v4635_v41 = vld [vmem:[#allocation2 + $0x4c4] ss:$24 sps:$4 sm:$0xff]  }
 0x1d3   :  { %2323 = vmatmul.mubr.bf16.gmra.mrb[64].mxu0 %v4582_v46  ;;  %v5271_v46 = vpop.f32.mrb[58].mxu1 }
 0x1d4   :  { %2330 = vmatprep.mubr.bf16.mxu0 %v4586_v47  ;;  %v1735_v47 = vpop.f32.mrb[59].mxu1 }
 0x1db   :  { %2331 = vmatmul.mubr.bf16.gmra.mrb[68].mxu0 %v4588_v52  ;;  %v5273_v52 = vpop.f32.mrb[60].mxu1 }
 0x1dc   :  { %2338 = vmatprep.mubr.bf16.mxu0 %v4592_v53  ;;  %v1740_v53 = vpop.f32.mrb[61].mxu1 }
 0x1dd   :  { %v5275_v55 = vpop.f32.mrb[62].mxu1 }
 0x1de   :  { %v1743_v57 = vpop.f32.mrb[63].mxu1 }
 0x1df   :  { %v5282_v63 = vpop.f32.mrb[64].mxu1 }
 0x1e3   :  { %2339 = vmatmul.mubr.bf16.gmra.mrb[72].mxu0 %v4594_v58  ;;  %v4643_v58 = vld [vmem:[#allocation2 + $0x4f0] ss:$24 sps:$4 sm:$0xff]  }
 0x1e4   :  { %2346 = vmatprep.mubr.bf16.mxu0 %v4598_v59  ;;  %v5280_v59 = vld [vmem:[%s5940_s2] ss:$0 sm:$0xff] }
 0x1e5   :  { %v1627_v27 = vadd.f32 %v5280_v59, %v5211_v13  ;;  %v1635_v53 = vadd.f32 %v5280_v59, %v5215_v20  ;;  %v4664_v20 = vld [vmem:[#allocation2 + $0x5b4] ss:$24 sps:$4 sm:$0xff]  }
 0x1eb   :  { %2347 = vmatmul.mubr.bf16.gmra.mrb[76].mxu0 %v4600_v1  ;;  %v1748_v1 = vpop.f32.mrb[65].mxu1 }
 0x1ec   :  { %2354 = vmatprep.mubr.bf16.mxu0 %v4604_v2  ;;  %v1619_v2 = vadd.f32 %v5280_v59, %v5207_v3  ;;  %v5286_v5 = vpop.f32.mrb[66].mxu1 }
 0x1ed   :  { %v1751_v8 = vpop.f32.mrb[67].mxu1 }
 0x1ee   :  { %v1638_v8 = vadd.f32 %v5280_v59, %v5217_v22 }
 0x1f3   :  { %2355 = vmatmul.mubr.bf16.gmra.mrb[80].mxu0 %v4606_v9 }
 0x1f4   :  { %2362 = vmatprep.mubr.bf16.mxu0 %v4611_v10  ;;  %v1622_v10 = vadd.f32 %v5280_v59, %v5209_v7 }
 0x1fb   :  { %2363 = vmatmul.mubr.bf16.gmra.mrb[84].mxu0 %v4613_v17  ;;  %v4649_v17 = vld [vmem:[#allocation2 + $0x520] ss:$24 sps:$4 sm:$0xff]  }
 0x1fc   :  { %2370 = vmatprep.mubr.bf16.mxu0 %v4617_v18 }
 0x203   :  { %2371 = vmatmul.mubr.bf16.gmra.mrb[88].mxu0 %v4619_v24 }
 0x204   :  { %2378 = vmatprep.mubr.bf16.mxu0 %v4623_v25  ;;  %v5290_v25 = vpop.f32.mrb[68].mxu1 }
 0x205   :  { %v1756_v3 = vpop.f32.mrb[69].mxu1 }
 0x206   :  { %v5294_v30 = vpop.f32.mrb[70].mxu1 }
 0x207   :  { %v1759_v7 = vpop.f32.mrb[71].mxu1 }
 0x20b   :  { %2379 = vmatmul.mubr.bf16.gmra.mrb[92].mxu0 %v4625_v31 }
 0x20c   :  { %2386 = vmatprep.mubr.bf16.mxu0 %v4629_v33  ;;  %v1630_v33 = vadd.f32 %v5280_v59, %v5213_v15 }
 0x213   :  { %2387 = vmatmul.mubr.bf16.gmra.mrb[96].mxu0 %v4631_v40  ;;  %v4655_v40 = vld [vmem:[#allocation2 + $0x550] ss:$24 sps:$4 sm:$0xff]  }
 0x214   :  { %2394 = vmatprep.mubr.bf16.mxu0 %v4635_v41 }
 0x21b   :  { %2395 = vmatmul.mubr.bf16.gmra.mrb[100].mxu0 %v4637_v49 }
 0x21c   :  { %2402 = vmatprep.mubr.bf16.mxu0 %v4641_v51  ;;  %v5298_v51 = vpop.f32.mrb[72].mxu1 }
 0x21d   :  { %v1764_v13 = vpop.f32.mrb[73].mxu1 }
 0x21e   :  { %v5302_v57 = vpop.f32.mrb[74].mxu1 }
 0x21f   :  { %v1767_v15 = vpop.f32.mrb[75].mxu1 }
 0x223   :  { %2403 = vmatmul.mubr.bf16.gmra.mrb[104].mxu0 %v4643_v58 }
 0x224   :  { %2410 = vmatprep.mubr.bf16.mxu0 %v4647_v61 }
 0x226   :  { %v2196_v9 = vpop.f32.mrb[0].mxu0 }
 0x227   :  { %v4071_v12 = vadd.f32 %v2196_v9, %v1619_v2  ;;  %v2198_v16 = vpop.f32.mrb[1].mxu0 }
 0x228   :  { %v2199_v18 = vpop.f32.mrb[2].mxu0 }
 0x229   :  { %v4073_v23 = vadd.f32 %v2199_v18, %v1622_v10  ;;  %v2201_v24 = vpop.f32.mrb[3].mxu0  ;;  %4672 = vtanh.f32 %v4071_v12  ;;  %v4662_v12 = vld [vmem:[#allocation2 + $0x580] ss:$24 sps:$4 sm:$0xff]  }
 0x22a   :  { %v1643_v24 = vadd.f32 %v5280_v59, %v5222_v29 }
 0x22b   :  { %4674 = vtanh.f32 %v4073_v23  ;;  %2411 = vmatmul.mubr.bf16.gmra.mrb[108].mxu0 %v4649_v17 }
 0x22c   :  { %2418 = vmatprep.mubr.bf16.mxu0 %v4653_v0  ;;  %v5307_v0 = vpop.f32.mrb[76].mxu1 }
 0x22d   :  { %v1772_v23 = vpop.f32.mrb[77].mxu1 }
 0x22e   :  { %v2204_v31 = vpop.f32.mrb[4].mxu0  ;;  %v5311_v3 = vpop.f32.mrb[78].mxu1 }
 0x22f   :  { %v4075_v35 = vadd.f32 %v2204_v31, %v1627_v27  ;;  %v2206_v39 = vpop.f32.mrb[5].mxu0  ;;  %v1775_v27 = vpop.f32.mrb[79].mxu1 }
 0x230   :  { %v2207_v41 = vpop.f32.mrb[6].mxu0  ;;  %v5316_v13 = vpop.f32.mrb[80].mxu1 }
 0x231   :  { %v4077_v47 = vadd.f32 %v2207_v41, %v1630_v33  ;;  %v2209_v49 = vpop.f32.mrb[7].mxu0  ;;  %4676 = vtanh.f32 %v4075_v35  ;;  %v1646_v35 = vadd.f32 %v5280_v59, %v5227_v32  ;;  %v4666_v41 = vld [vmem:[#allocation2 + $0x5b0] ss:$24 sps:$4 sm:$0xff]  }
 0x233   :  { %4678 = vtanh.f32 %v4077_v47  ;;  %2419 = vmatmul.mubr.bf16.gmra.mrb[112].mxu0 %v4655_v40  ;;  %v4673_v58 = vpop.eup %4672  ;;  %v4667_v47 = vld [vmem:[#allocation2 + $0x5e4] ss:$24 sps:$4 sm:$0xff]  }
 0x234   :  { %2426 = vmatprep.mubr.bf16.mxu0 %v4660_v45 }
 0x235   :  { %v4675_v61 = vpop.eup %4674 }
 0x236   :  { %v2212_v1 = vpop.f32.mrb[8].mxu0  ;;  %v2515_v2 = vpack.c.bf16 %v4675_v61, %v4673_v58  ;;  %v1651_v58 = vadd.f32 %v5280_v59, %v5229_v36 }
 0x237   :  { %v4079_v9 = vadd.f32 %v2212_v1, %v1635_v53  ;;  %v2214_v10 = vpop.f32.mrb[9].mxu0  ;;  %v1780_v53 = vpop.f32.mrb[81].mxu1 }
 0x238   :  { %v2215_v16 = vpop.f32.mrb[10].mxu0  ;;  %3938 = vmatprep.mubr.msk.bf16.mxu1 %vm2586_vm0, %v2515_v2  ;;  %v5320_v15 = vpop.f32.mrb[82].mxu1 }
 0x239   :  { %v4081_v17 = vadd.f32 %v2215_v16, %v1638_v8  ;;  %v2217_v18 = vpop.f32.mrb[11].mxu0  ;;  %4680 = vtanh.f32 %v4079_v9  ;;  %v1783_v61 = vpop.f32.mrb[83].mxu1  ;;  %v1654_v9 = vadd.f32 %v5280_v59, %v5231_v38  ;;  %v4669_v16 = vld [vmem:[#allocation2 + $0x5e0] ss:$24 sps:$4 sm:$0xff]  }
 0x23a   :  { %v5325_v18 = vpop.f32.mrb[84].mxu1 }
 0x23b   :  { %4682 = vtanh.f32 %v4081_v17  ;;  %2427 = vmatmul.mubr.bf16.gmra.mrb[116].mxu0 %v4662_v12  ;;  %v4677_v22 = vpop.eup %4676  ;;  %v1788_v23 = vpop.f32.mrb[85].mxu1 }
 0x23c   :  { %2434 = vmatprep.mubr.bf16.mxu0 %v4664_v20 }
 0x23d   :  { %v4679_v7 = vpop.eup %4678 }
 0x23e   :  { %v2516_v31 = vpack.c.bf16 %v4679_v7, %v4677_v22  ;;  %v2220_v33 = vpop.f32.mrb[12].mxu0  ;;  %v5329_v22 = vpop.f32.mrb[86].mxu1 }
 0x23f   :  { %v4083_v39 = vadd.f32 %v2220_v33, %v1643_v24  ;;  %v2222_v40 = vpop.f32.mrb[13].mxu0  ;;  %v1659_v24 = vadd.f32 %v5280_v59, %v5233_v42  ;;  %v1791_v27 = vpop.f32.mrb[87].mxu1 }
 0x240   :  { %v2223_v45 = vpop.f32.mrb[14].mxu0  ;;  %3939 = vmatmul.mubr.msk.bf16.vlgmr.msra.gmra.mrb[128].mxu1 %vm2586_vm0, %v2516_v31 }
 0x241   :  { %v4085_v29 = vadd.f32 %v2223_v45, %v1646_v35  ;;  %v2225_v49 = vpop.f32.mrb[15].mxu0  ;;  %4684 = vtanh.f32 %v4083_v39  ;;  %v1662_v35 = vadd.f32 %v5280_v59, %v5235_v44 }
 0x242   :  { %v1667_v49 = vadd.f32 %v5280_v59, %v5237_v48 }
 0x243   :  { %4686 = vtanh.f32 %v4085_v29  ;;  %2435 = vmatmul.mubr.bf16.gmra.mrb[120].mxu0 %v4666_v41  ;;  %v4681_v32 = vpop.eup %4680  ;;  %v5334_v29 = vpop.f32.mrb[88].mxu1 }
 0x244   :  { %2442 = vmatprep.mubr.bf16.mxu0 %v4667_v47  ;;  %v1796_v42 = vpop.f32.mrb[89].mxu1 }
 0x245   :  { %v4683_v1 = vpop.eup %4682  ;;  %v5338_v53 = vpop.f32.mrb[90].mxu1 }
 0x246   :  { %v2228_v2 = vpop.f32.mrb[16].mxu0  ;;  %v2517_v8 = vpack.c.bf16 %v4683_v1, %v4681_v32  ;;  %v1799_v32 = vpop.f32.mrb[91].mxu1 }
 0x247   :  { %v4087_v10 = vadd.f32 %v2228_v2, %v1651_v58  ;;  %v2230_v12 = vpop.f32.mrb[17].mxu0  ;;  %v1670_v2 = vadd.f32 %v5280_v59, %v5239_v50 }
 0x248   :  { %v2231_v20 = vpop.f32.mrb[18].mxu0  ;;  %3942 = vmatprep.mubr.msk.bf16.mxu1 %vm2586_vm0, %v2517_v8 }
 0x249   :  { %v4089_v17 = vadd.f32 %v2231_v20, %v1654_v9  ;;  %v2233_v36 = vpop.f32.mrb[19].mxu0  ;;  %4688 = vtanh.f32 %v4087_v10  ;;  %v5343_v20 = vpop.f32.mrb[92].mxu1 }
 0x24a   :  { %v1804_v48 = vpop.f32.mrb[93].mxu1 }
 0x24b   :  { %4690 = vtanh.f32 %v4089_v17  ;;  %2443 = vmatmul.mubr.bf16.gmra.mrb[124].mxu0 %v4669_v16  ;;  %v4685_v38 = vpop.eup %4684  ;;  %v1675_v17 = vadd.f32 %v5280_v59, %v5241_v54  ;;  %v5347_v36 = vpop.f32.mrb[94].mxu1 }
 0x24d   :  { %v4687_v7 = vpop.eup %4686 }
 0x24e   :  { %v2236_v31 = vpop.f32.mrb[20].mxu0  ;;  %v2518_v33 = vpack.c.bf16 %v4687_v7, %v4685_v38  ;;  %v1678_v7 = vadd.f32 %v5280_v59, %v5243_v56 }
 0x24f   :  { %v4091_v39 = vadd.f32 %v2236_v31, %v1659_v24  ;;  %v2238_v40 = vpop.f32.mrb[21].mxu0  ;;  %v1807_v24 = vpop.f32.mrb[95].mxu1 }
 0x250   :  { %v2239_v41 = vpop.f32.mrb[22].mxu0  ;;  %3943 = vmatmul.mubr.msk.bf16.gmra.mrb[132].mxu1 %vm2586_vm0, %v2518_v33 }
 0x251   :  { %v4093_v45 = vadd.f32 %v2239_v41, %v1662_v35  ;;  %v2241_v47 = vpop.f32.mrb[23].mxu0  ;;  %4692 = vtanh.f32 %v4091_v39  ;;  %v5352_v41 = vpop.f32.mrb[96].mxu1 }
 0x252   :  { %v1812_v54 = vpop.f32.mrb[97].mxu1 }
 0x253   :  { %4694 = vtanh.f32 %v4093_v45  ;;  %v4689_v58 = vpop.eup %4688  ;;  %v1683_v45 = vadd.f32 %v5280_v59, %v5245_v60  ;;  %v5356_v47 = vpop.f32.mrb[98].mxu1 }
 0x255   :  { %v4691_v44 = vpop.eup %4690 }
 0x256   :  { %v2244_v61 = vpop.f32.mrb[24].mxu0  ;;  %v2519_v1 = vpack.c.bf16 %v4691_v44, %v4689_v58  ;;  %v1686_v44 = vadd.f32 %v5280_v59, %v5247_v62 }
 0x257   :  { %v4095_v8 = vadd.f32 %v2244_v61, %v1667_v49  ;;  %v2246_v9 = vpop.f32.mrb[25].mxu0  ;;  %v1815_v49 = vpop.f32.mrb[99].mxu1 }
 0x258   :  { %v2247_v10 = vpop.f32.mrb[26].mxu0  ;;  %3946 = vmatprep.mubr.msk.bf16.mxu1 %vm2586_vm0, %v2519_v1 }
 0x259   :  { %v4097_v12 = vadd.f32 %v2247_v10, %v1670_v2  ;;  %v2249_v16 = vpop.f32.mrb[27].mxu0  ;;  %4696 = vtanh.f32 %v4095_v8  ;;  %v5361_v10 = vpop.f32.mrb[100].mxu1 }
 0x25a   :  { %v1820_v60 = vpop.f32.mrb[101].mxu1 }
 0x25b   :  { %4698 = vtanh.f32 %v4097_v12  ;;  %v4693_v23 = vpop.eup %4692  ;;  %v1691_v12 = vadd.f32 %v5280_v59, %v5249_v4  ;;  %v5365_v16 = vpop.f32.mrb[102].mxu1 }
 0x25d   :  { %v4695_v50 = vpop.eup %4694 }
 0x25e   :  { %v2252_v38 = vpop.f32.mrb[28].mxu0  ;;  %v2520_v27 = vpack.c.bf16 %v4695_v50, %v4693_v23  ;;  %v1694_v50 = vadd.f32 %v5280_v59, %v5251_v6 }
 0x25f   :  { %v4099_v31 = vadd.f32 %v2252_v38, %v1675_v17  ;;  %v2254_v33 = vpop.f32.mrb[29].mxu0  ;;  %v1823_v17 = vpop.f32.mrb[103].mxu1 }
 0x260   :  { %v2255_v35 = vpop.f32.mrb[30].mxu0  ;;  %3947 = vmatmul.mubr.msk.bf16.gmra.mrb[136].mxu1 %vm2586_vm0, %v2520_v27 }
 0x261   :  { %v4101_v39 = vadd.f32 %v2255_v35, %v1678_v7  ;;  %v2257_v40 = vpop.f32.mrb[31].mxu0  ;;  %4700 = vtanh.f32 %v4099_v31  ;;  %v5370_v35 = vpop.f32.mrb[104].mxu1 }
 0x262   :  { %v1828_v4 = vpop.f32.mrb[105].mxu1 }
 0x263   :  { %4702 = vtanh.f32 %v4101_v39  ;;  %v4697_v42 = vpop.eup %4696  ;;  %v1699_v39 = vadd.f32 %v5280_v59, %v5253_v11  ;;  %v5374_v40 = vpop.f32.mrb[106].mxu1 }
 0x265   :  { %v4699_v56 = vpop.eup %4698 }
 0x266   :  { %v2260_v58 = vpop.f32.mrb[32].mxu0  ;;  %v2521_v32 = vpack.c.bf16 %v4699_v56, %v4697_v42  ;;  %v1702_v56 = vadd.f32 %v5280_v59, %v5255_v14 }
 0x267   :  { %v4103_v61 = vadd.f32 %v2260_v58, %v1683_v45  ;;  %v2262_v1 = vpop.f32.mrb[33].mxu0  ;;  %v1831_v45 = vpop.f32.mrb[107].mxu1 }
 0x268   :  { %v2263_v2 = vpop.f32.mrb[34].mxu0  ;;  %3950 = vmatprep.mubr.msk.bf16.mxu1 %vm2586_vm0, %v2521_v32 }
 0x269   :  { %v4105_v8 = vadd.f32 %v2263_v2, %v1686_v44  ;;  %v2265_v9 = vpop.f32.mrb[35].mxu0  ;;  %4704 = vtanh.f32 %v4103_v61  ;;  %v5379_v2 = vpop.f32.mrb[108].mxu1 }
 0x26a   :  { %v1836_v11 = vpop.f32.mrb[109].mxu1 }
 0x26b   :  { %4706 = vtanh.f32 %v4105_v8  ;;  %v4701_v48 = vpop.eup %4700  ;;  %v1707_v8 = vadd.f32 %v5280_v59, %v5257_v19  ;;  %v5383_v9 = vpop.f32.mrb[110].mxu1  ;;  %v1723_v11 = vadd.f32 %v5280_v59, %v5265_v34 }
 0x26d   :  { %v4703_v62 = vpop.eup %4702 }
 0x26e   :  { %v2268_v23 = vpop.f32.mrb[36].mxu0  ;;  %v2522_v24 = vpack.c.bf16 %v4703_v62, %v4701_v48  ;;  %v1710_v62 = vadd.f32 %v5280_v59, %v5259_v21 }
 0x26f   :  { %v4107_v38 = vadd.f32 %v2268_v23, %v1691_v12  ;;  %v2270_v27 = vpop.f32.mrb[37].mxu0  ;;  %v1839_v12 = vpop.f32.mrb[111].mxu1 }
 0x270   :  { %v2271_v7 = vpop.f32.mrb[38].mxu0  ;;  %3951 = vmatmul.mubr.msk.bf16.gmra.mrb[140].mxu1 %vm2586_vm0, %v2522_v24 }
 0x271   :  { %v4109_v31 = vadd.f32 %v2271_v7, %v1694_v50  ;;  %v2273_v33 = vpop.f32.mrb[39].mxu0  ;;  %4708 = vtanh.f32 %v4107_v38  ;;  %v5388_v7 = vpop.f32.mrb[112].mxu1 }
 0x272   :  { %v1844_v19 = vpop.f32.mrb[113].mxu1 }
 0x273   :  { %4710 = vtanh.f32 %v4109_v31  ;;  %v4705_v54 = vpop.eup %4704  ;;  %v1715_v31 = vadd.f32 %v5280_v59, %v5261_v26  ;;  %v5392_v33 = vpop.f32.mrb[114].mxu1 }
 0x275   :  { %v4707_v6 = vpop.eup %4706 }
 0x276   :  { %v2276_v42 = vpop.f32.mrb[40].mxu0  ;;  %v2523_v49 = vpack.c.bf16 %v4707_v6, %v4705_v54  ;;  %v1718_v6 = vadd.f32 %v5280_v59, %v5263_v28 }
 0x277   :  { %v4111_v58 = vadd.f32 %v2276_v42, %v1699_v39  ;;  %v2278_v32 = vpop.f32.mrb[41].mxu0  ;;  %v1847_v39 = vpop.f32.mrb[115].mxu1 }
 0x278   :  { %v2279_v44 = vpop.f32.mrb[42].mxu0  ;;  %3954 = vmatprep.mubr.msk.bf16.mxu1 %vm2586_vm0, %v2523_v49 }
 0x279   :  { %v4113_v61 = vadd.f32 %v2279_v44, %v1702_v56  ;;  %v2281_v1 = vpop.f32.mrb[43].mxu0  ;;  %4712 = vtanh.f32 %v4111_v58  ;;  %v5396_v56 = vpop.f32.mrb[116].mxu1 }
 0x27a   :  { %v1852_v32 = vpop.f32.mrb[117].mxu1 }
 0x27b   :  { %4714 = vtanh.f32 %v4113_v61  ;;  %v4709_v60 = vpop.eup %4708  ;;  %v5399_v61 = vpop.f32.mrb[118].mxu1 }
 0x27c   :  { %v1855_v1 = vpop.f32.mrb[119].mxu1 }
 0x27d   :  { %v4711_v14 = vpop.eup %4710  ;;  %v1739_v1 = vadd.f32 %v5280_v59, %v5273_v52  ;;  %v4670_v52 = vld [vmem:[%s5943_s5] sm:$0xff]  }
 0x27e   :  { %v2284_v48 = vpop.f32.mrb[44].mxu0  ;;  %v2524_v17 = vpack.c.bf16 %v4711_v14, %v4709_v60  ;;  %4002 = vmatprep.subr.bf16.mxu1 %v4670_v52 }
 0x27f   :  { %v4115_v23 = vadd.f32 %v2284_v48, %v1707_v8  ;;  %v2286_v24 = vpop.f32.mrb[45].mxu0  ;;  %v5403_v8 = vpop.f32.mrb[120].mxu1  ;;  %4003 = vmatpush3.bf16.msra.mxu1 %v4670_v52 }
 0x280   :  { %v2287_v50 = vpop.f32.mrb[46].mxu0  ;;  %3955 = vmatmul.mubr.msk.bf16.gmra.mrb[144].mxu1 %vm2586_vm0, %v2524_v17  ;;  %v1860_v60 = vpop.f32.mrb[121].mxu1 }
 0x281   :  { %v4117_v38 = vadd.f32 %v2287_v50, %v1710_v62  ;;  %v2289_v27 = vpop.f32.mrb[47].mxu0  ;;  %4716 = vtanh.f32 %v4115_v23  ;;  %v5405_v14 = vpop.f32.mrb[122].mxu1  ;;  %v1726_v23 = vadd.f32 %v5280_v59, %v5267_v37 }
 0x282   :  { %v1863_v62 = vpop.f32.mrb[123].mxu1 }
 0x283   :  { %4718 = vtanh.f32 %v4117_v38  ;;  %v4713_v4 = vpop.eup %4712  ;;  %v5409_v38 = vpop.f32.mrb[124].mxu1 }
 0x284   :  { %v1868_v34 = vpop.f32.mrb[125].mxu1 }
 0x285   :  { %v4715_v21 = vpop.eup %4714 }
 0x286   :  { %v2292_v54 = vpop.f32.mrb[48].mxu0  ;;  %v2525_v45 = vpack.c.bf16 %v4715_v21, %v4713_v4  ;;  %v5412_v4 = vpop.f32.mrb[126].mxu1  ;;  %v1731_v21 = vadd.f32 %v5280_v59, %v5269_v43 }
 0x287   :  { %v4119_v42 = vadd.f32 %v2292_v54, %v1715_v31  ;;  %v2294_v49 = vpop.f32.mrb[49].mxu0  ;;  %v1871_v39 = vpop.f32.mrb[127].mxu1 }
 0x288   :  { %v2295_v58 = vpop.f32.mrb[50].mxu0  ;;  %3958 = vmatprep.mubr.msk.bf16.mxu1 %vm2586_vm0, %v2525_v45 }
 0x289   :  { %v4121_v44 = vadd.f32 %v2295_v58, %v1718_v6  ;;  %v2297_v26 = vpop.f32.mrb[51].mxu0  ;;  %4720 = vtanh.f32 %v4119_v42  ;;  %v1734_v42 = vadd.f32 %v5280_v59, %v5271_v46 }
 0x28b   :  { %4722 = vtanh.f32 %v4121_v44  ;;  %v4717_v28 = vpop.eup %4716 }
 0x28d   :  { %v4719_v12 = vpop.eup %4718 }
 0x28e   :  { %v2300_v48 = vpop.f32.mrb[52].mxu0  ;;  %v2526_v17 = vpack.c.bf16 %v4719_v12, %v4717_v28  ;;  %v1742_v12 = vadd.f32 %v5280_v59, %v5275_v55 }
 0x28f   :  { %v4123_v24 = vadd.f32 %v2300_v48, %v1723_v11  ;;  %v2302_v50 = vpop.f32.mrb[53].mxu0 }
 0x290   :  { %v2303_v27 = vpop.f32.mrb[54].mxu0  ;;  %3959 = vmatmul.mubr.msk.bf16.gmra.mrb[148].mxu1 %vm2586_vm0, %v2526_v17 }
 0x291   :  { %v4125_v19 = vadd.f32 %v2303_v27, %v1726_v23  ;;  %v2305_v31 = vpop.f32.mrb[55].mxu0  ;;  %4724 = vtanh.f32 %v4123_v24  ;;  %v1747_v24 = vadd.f32 %v5280_v59, %v5282_v63 }
 0x293   :  { %4726 = vtanh.f32 %v4125_v19  ;;  %v4721_v54 = vpop.eup %4720  ;;  %v1750_v19 = vadd.f32 %v5280_v59, %v5286_v5 }
 0x295   :  { %v4723_v37 = vpop.eup %4722 }
 0x296   :  { %v2308_v45 = vpop.f32.mrb[56].mxu0  ;;  %v2527_v6 = vpack.c.bf16 %v4723_v37, %v4721_v54  ;;  %v1755_v37 = vadd.f32 %v5280_v59, %v5290_v25  ;;  %v4671_v25 = vld [vmem:[%s5943_s5 + $0x8] sm:$0xff]  }
 0x297   :  { %v4127_v49 = vadd.f32 %v2308_v45, %v1731_v21  ;;  %v2310_v58 = vpop.f32.mrb[57].mxu0  ;;  %4004 = vmatprep.subr.bf16.mxu1 %v4671_v25 }
 0x298   :  { %v2311_v32 = vpop.f32.mrb[58].mxu0  ;;  %3962 = vmatprep.mubr.msk.bf16.mxu1 %vm2586_vm0, %v2527_v6  ;;  %v1758_v58 = vadd.f32 %v5280_v59, %v5294_v30  ;;  %4005 = vmatpush3.bf16.msra.mxu1 %v4671_v25 }
 0x299   :  { %v4129_v44 = vadd.f32 %v2311_v32, %v1734_v42  ;;  %v2313_v26 = vpop.f32.mrb[59].mxu0  ;;  %4728 = vtanh.f32 %v4127_v49 }
 0x29b   :  { %4730 = vtanh.f32 %v4129_v44  ;;  %v4725_v43 = vpop.eup %4724 }
 0x29d   :  { %v4727_v11 = vpop.eup %4726 }
 0x29e   :  { %v2316_v28 = vpop.f32.mrb[60].mxu0  ;;  %v2528_v60 = vpack.c.bf16 %v4727_v11, %v4725_v43  ;;  %v1763_v43 = vadd.f32 %v5280_v59, %v5298_v51 }
 0x29f   :  { %v4131_v46 = vadd.f32 %v2316_v28, %v1739_v1  ;;  %v2318_v48 = vpop.f32.mrb[61].mxu0 }
 0x2a0   :  { %v2319_v17 = vpop.f32.mrb[62].mxu0  ;;  %3963 = vmatmul.mubr.msk.bf16.gmra.mrb[152].mxu1 %vm2586_vm0, %v2528_v60 }
 0x2a1   :  { %v4133_v62 = vadd.f32 %v2319_v17, %v1742_v12  ;;  %v2321_v23 = vpop.f32.mrb[63].mxu0  ;;  %4732 = vtanh.f32 %v4131_v46  ;;  %v1766_v12 = vadd.f32 %v5280_v59, %v5302_v57 }
 0x2a2   :  { %v1771_v23 = vadd.f32 %v5280_v59, %v5307_v0 }
 0x2a3   :  { %4734 = vtanh.f32 %v4133_v62  ;;  %v4729_v50 = vpop.eup %4728 }
 0x2a5   :  { %v4731_v27 = vpop.eup %4730 }
 0x2a6   :  { %v2324_v55 = vpop.f32.mrb[64].mxu0  ;;  %v2529_v34 = vpack.c.bf16 %v4731_v27, %v4729_v50 }
 0x2a7   :  { %v4135_v31 = vadd.f32 %v2324_v55, %v1747_v24  ;;  %v2326_v39 = vpop.f32.mrb[65].mxu0  ;;  %v1774_v55 = vadd.f32 %v5280_v59, %v5311_v3 }
 0x2a8   :  { %v2327_v21 = vpop.f32.mrb[66].mxu0  ;;  %3966 = vmatprep.mubr.msk.bf16.mxu1 %vm2586_vm0, %v2529_v34 }
 0x2a9   :  { %v4137_v54 = vadd.f32 %v2327_v21, %v1750_v19  ;;  %v2329_v63 = vpop.f32.mrb[67].mxu0  ;;  %4736 = vtanh.f32 %v4135_v31  ;;  %v1779_v21 = vadd.f32 %v5280_v59, %v5316_v13 }
 0x2ab   :  { %4738 = vtanh.f32 %v4137_v54  ;;  %v4733_v45 = vpop.eup %4732 }
 0x2ad   :  { %v4735_v6 = vpop.eup %4734 }
 0x2ae   :  { %v2332_v42 = vpop.f32.mrb[68].mxu0  ;;  %v2530_v49 = vpack.c.bf16 %v4735_v6, %v4733_v45  ;;  %v1782_v45 = vadd.f32 %v5280_v59, %v5320_v15 }
 0x2af   :  { %v4139_v5 = vadd.f32 %v2332_v42, %v1755_v37  ;;  %v2334_v32 = vpop.f32.mrb[69].mxu0 }
 0x2b0   :  { %v2335_v44 = vpop.f32.mrb[70].mxu0  ;;  %3967 = vmatmul.mubr.msk.bf16.gmra.mrb[156].mxu1 %vm2586_vm0, %v2530_v49 }
 0x2b1   :  { %v4141_v26 = vadd.f32 %v2335_v44, %v1758_v58  ;;  %v2337_v1 = vpop.f32.mrb[71].mxu0  ;;  %4740 = vtanh.f32 %v4139_v5  ;;  %v1787_v5 = vadd.f32 %v5280_v59, %v5325_v18 }
 0x2b2   :  { %v1790_v1 = vadd.f32 %v5280_v59, %v5329_v22 }
 0x2b3   :  { %4742 = vtanh.f32 %v4141_v26  ;;  %v4737_v11 = vpop.eup %4736 }
 0x2b5   :  { %v4739_v28 = vpop.eup %4738 }
 0x2b6   :  { %v2340_v30 = vpop.f32.mrb[72].mxu0  ;;  %v2531_v60 = vpack.c.bf16 %v4739_v28, %v4737_v11 }
 0x2b7   :  { %v4143_v46 = vadd.f32 %v2340_v30, %v1763_v43  ;;  %v2342_v48 = vpop.f32.mrb[73].mxu0  ;;  %v1795_v30 = vadd.f32 %v5280_v59, %v5334_v29 }
 0x2b8   :  { %v2343_v17 = vpop.f32.mrb[74].mxu0  ;;  %3970 = vmatprep.mubr.msk.bf16.mxu1 %vm2586_vm0, %v2531_v60  ;;  %v1798_v48 = vadd.f32 %v5280_v59, %v5338_v53 }
 0x2b9   :  { %v4145_v62 = vadd.f32 %v2343_v17, %v1766_v12  ;;  %v2345_v51 = vpop.f32.mrb[75].mxu0  ;;  %4744 = vtanh.f32 %v4143_v46 }
 0x2bb   :  { %4746 = vtanh.f32 %v4145_v62  ;;  %v4741_v24 = vpop.eup %4740 }
 0x2bd   :  { %v4743_v52 = vpop.eup %4742 }
 0x2be   :  { %v2348_v50 = vpop.f32.mrb[76].mxu0  ;;  %v2532_v27 = vpack.c.bf16 %v4743_v52, %v4741_v24  ;;  %v1803_v24 = vadd.f32 %v5280_v59, %v5343_v20 }
 0x2bf   :  { %v4147_v57 = vadd.f32 %v2348_v50, %v1771_v23  ;;  %v2350_v34 = vpop.f32.mrb[77].mxu0 }
 0x2c0   :  { %v2351_v19 = vpop.f32.mrb[78].mxu0  ;;  %3971 = vmatmul.mubr.msk.bf16.gmra.mrb[160].mxu1 %vm2586_vm0, %v2532_v27 }
 0x2c1   :  { %v4149_v31 = vadd.f32 %v2351_v19, %v1774_v55  ;;  %v2353_v39 = vpop.f32.mrb[79].mxu0  ;;  %4748 = vtanh.f32 %v4147_v57  ;;  %v1806_v55 = vadd.f32 %v5280_v59, %v5347_v36 }
 0x2c2   :  { %v1811_v39 = vadd.f32 %v5280_v59, %v5352_v41 }
 0x2c3   :  { %4750 = vtanh.f32 %v4149_v31  ;;  %v4745_v0 = vpop.eup %4744 }
 0x2c5   :  { %v4747_v54 = vpop.eup %4746 }
 0x2c6   :  { %v2356_v63 = vpop.f32.mrb[80].mxu0  ;;  %v2533_v37 = vpack.c.bf16 %v4747_v54, %v4745_v0 }
 0x2c7   :  { %v4151_v3 = vadd.f32 %v2356_v63, %v1779_v21  ;;  %v2358_v6 = vpop.f32.mrb[81].mxu0  ;;  %v1814_v63 = vadd.f32 %v5280_v59, %v5356_v47 }
 0x2c8   :  { %v2359_v42 = vpop.f32.mrb[82].mxu0  ;;  %3974 = vmatprep.mubr.msk.bf16.mxu1 %vm2586_vm0, %v2533_v37 }
 0x2c9   :  { %v4153_v49 = vadd.f32 %v2359_v42, %v1782_v45  ;;  %v2361_v58 = vpop.f32.mrb[83].mxu0  ;;  %4752 = vtanh.f32 %v4151_v3  ;;  %v1819_v42 = vadd.f32 %v5280_v59, %v5361_v10 }
 0x2cb   :  { %4754 = vtanh.f32 %v4153_v49  ;;  %v4749_v13 = vpop.eup %4748 }
 0x2cd   :  { %v4751_v32 = vpop.eup %4750 }
 0x2ce   :  { %v2364_v44 = vpop.f32.mrb[84].mxu0  ;;  %v2534_v26 = vpack.c.bf16 %v4751_v32, %v4749_v13  ;;  %v1822_v13 = vadd.f32 %v5280_v59, %v5365_v16 }
 0x2cf   :  { %v4155_v15 = vadd.f32 %v2364_v44, %v1787_v5  ;;  %v2366_v43 = vpop.f32.mrb[85].mxu0 }
 0x2d0   :  { %v2367_v25 = vpop.f32.mrb[86].mxu0  ;;  %3975 = vmatmul.mubr.msk.bf16.gmra.mrb[164].mxu1 %vm2586_vm0, %v2534_v26 }
 0x2d1   :  { %v4157_v11 = vadd.f32 %v2367_v25, %v1790_v1  ;;  %v2369_v28 = vpop.f32.mrb[87].mxu0  ;;  %4756 = vtanh.f32 %v4155_v15  ;;  %v1827_v15 = vadd.f32 %v5280_v59, %v5370_v35 }
 0x2d2   :  { %v1830_v28 = vadd.f32 %v5280_v59, %v5374_v40 }
 0x2d3   :  { %4758 = vtanh.f32 %v4157_v11  ;;  %v4753_v18 = vpop.eup %4752 }
 0x2d5   :  { %v4755_v60 = vpop.eup %4754 }
 0x2d6   :  { %v2372_v12 = vpop.f32.mrb[88].mxu0  ;;  %v2535_v46 = vpack.c.bf16 %v4755_v60, %v4753_v18 }
 0x2d7   :  { %v4159_v22 = vadd.f32 %v2372_v12, %v1795_v30  ;;  %v2374_v17 = vpop.f32.mrb[89].mxu0 }
 0x2d8   :  { %v2375_v62 = vpop.f32.mrb[90].mxu0  ;;  %3978 = vmatprep.mubr.msk.bf16.mxu1 %vm2586_vm0, %v2535_v46  ;;  %v1835_v46 = vadd.f32 %v5280_v59, %v5379_v2 }
 0x2d9   :  { %v4161_v51 = vadd.f32 %v2375_v62, %v1798_v48  ;;  %v2377_v23 = vpop.f32.mrb[91].mxu0  ;;  %4760 = vtanh.f32 %v4159_v22  ;;  %v1838_v62 = vadd.f32 %v5280_v59, %v5383_v9 }
 0x2db   :  { %4762 = vtanh.f32 %v4161_v51  ;;  %v4757_v29 = vpop.eup %4756 }
 0x2dd   :  { %v4759_v52 = vpop.eup %4758 }
 0x2de   :  { %v2380_v50 = vpop.f32.mrb[92].mxu0  ;;  %v2536_v27 = vpack.c.bf16 %v4759_v52, %v4757_v29  ;;  %v1843_v52 = vadd.f32 %v5280_v59, %v5388_v7 }
 0x2df   :  { %v4163_v53 = vadd.f32 %v2380_v50, %v1803_v24  ;;  %v2382_v57 = vpop.f32.mrb[93].mxu0 }
 0x2e0   :  { %v2383_v34 = vpop.f32.mrb[94].mxu0  ;;  %3979 = vmatmul.mubr.msk.bf16.gmra.mrb[168].mxu1 %vm2586_vm0, %v2536_v27 }
 0x2e1   :  { %v4165_v19 = vadd.f32 %v2383_v34, %v1806_v55  ;;  %v2385_v31 = vpop.f32.mrb[95].mxu0  ;;  %4764 = vtanh.f32 %v4163_v53  ;;  %v1846_v53 = vadd.f32 %v5280_v59, %v5392_v33 }
 0x2e3   :  { %4766 = vtanh.f32 %v4165_v19  ;;  %v4761_v20 = vpop.eup %4760 }
 0x2e5   :  { %v4763_v21 = vpop.eup %4762 }
 0x2e6   :  { %v2388_v0 = vpop.f32.mrb[96].mxu0  ;;  %v2537_v54 = vpack.c.bf16 %v4763_v21, %v4761_v20 }
 0x2e7   :  { %v4167_v36 = vadd.f32 %v2388_v0, %v1811_v39  ;;  %v2390_v37 = vpop.f32.mrb[97].mxu0  ;;  %v1851_v39 = vadd.f32 %v5280_v59, %v5396_v56  ;;  %v1859_v56 = vadd.f32 %v5280_v59, %v5403_v8 }
 0x2e8   :  { %v2391_v45 = vpop.f32.mrb[98].mxu0  ;;  %3982 = vmatprep.mubr.msk.bf16.mxu1 %vm2586_vm0, %v2537_v54  ;;  %v1854_v54 = vadd.f32 %v5280_v59, %v5399_v61  ;;  %v4928_v59 = vld [vmem:[%s5940_s2] ss:$0 sm:$0xff] }
 0x2e9   :  { %v4169_v3 = vadd.f32 %v2391_v45, %v1814_v63  ;;  %v2393_v6 = vpop.f32.mrb[99].mxu0  ;;  %4768 = vtanh.f32 %v4167_v36  ;;  %v1862_v8 = vadd.f32 %v4928_v59, %v5405_v14 }
 0x2eb   :  { %4770 = vtanh.f32 %v4169_v3  ;;  %v4765_v41 = vpop.eup %4764  ;;  %v5503_v3 = vld [vmem:[%s5942_s4] ss:$0 sm:$0xff] }
 0x2ed   :  { %v4767_v49 = vpop.eup %4766 }
 0x2ee   :  { %v2396_v58 = vpop.f32.mrb[100].mxu0  ;;  %v2538_v5 = vpack.c.bf16 %v4767_v49, %v4765_v41 }
 0x2ef   :  { %v4171_v47 = vadd.f32 %v2396_v58, %v1819_v42  ;;  %v2398_v32 = vpop.f32.mrb[101].mxu0 }
 0x2f0   :  { %v2399_v44 = vpop.f32.mrb[102].mxu0  ;;  %3983 = vmatmul.mubr.msk.bf16.gmra.mrb[172].mxu1 %vm2586_vm0, %v2538_v5 }
 0x2f1   :  { %v4173_v26 = vadd.f32 %v2399_v44, %v1822_v13  ;;  %v2401_v1 = vpop.f32.mrb[103].mxu0  ;;  %4772 = vtanh.f32 %v4171_v47 }
 0x2f3   :  { %4774 = vtanh.f32 %v4173_v26  ;;  %v4769_v10 = vpop.eup %4768 }
 0x2f5   :  { %v4771_v43 = vpop.eup %4770 }
 0x2f6   :  { %v2404_v25 = vpop.f32.mrb[104].mxu0  ;;  %v2539_v11 = vpack.c.bf16 %v4771_v43, %v4769_v10 }
 0x2f7   :  { %v4175_v16 = vadd.f32 %v2404_v25, %v1827_v15  ;;  %v2406_v30 = vpop.f32.mrb[105].mxu0 }
 0x2f8   :  { %v2407_v18 = vpop.f32.mrb[106].mxu0  ;;  %3986 = vmatprep.mubr.msk.bf16.mxu1 %vm2586_vm0, %v2539_v11  ;;  %v1867_v11 = vadd.f32 %v4928_v59, %v5409_v38 }
 0x2f9   :  { %v4177_v60 = vadd.f32 %v2407_v18, %v1830_v28  ;;  %v2409_v12 = vpop.f32.mrb[107].mxu0  ;;  %4776 = vtanh.f32 %v4175_v16  ;;  %v1870_v18 = vadd.f32 %v4928_v59, %v5412_v4 }
 0x2fb   :  { %4778 = vtanh.f32 %v4177_v60  ;;  %v4773_v35 = vpop.eup %4772 }
 0x2fd   :  { %v4775_v48 = vpop.eup %4774 }
 0x2fe   :  { %v2412_v22 = vpop.f32.mrb[108].mxu0  ;;  %v2540_v17 = vpack.c.bf16 %v4775_v48, %v4773_v35 }
 0x2ff   :  { %v4179_v40 = vadd.f32 %v2412_v22, %v1835_v46  ;;  %v2414_v51 = vpop.f32.mrb[109].mxu0 }
 0x300   :  { %v2415_v23 = vpop.f32.mrb[110].mxu0  ;;  %3987 = vmatmul.mubr.msk.bf16.gmra.mrb[176].mxu1 %vm2586_vm0, %v2540_v17 }
 0x301   :  { %v4181_v24 = vadd.f32 %v2415_v23, %v1838_v62  ;;  %v2417_v29 = vpop.f32.mrb[111].mxu0  ;;  %4780 = vtanh.f32 %v4179_v40 }
 0x303   :  { %4782 = vtanh.f32 %v4181_v24  ;;  %v4777_v2 = vpop.eup %4776 }
 0x305   :  { %v4779_v50 = vpop.eup %4778 }
 0x306   :  { %v2420_v27 = vpop.f32.mrb[112].mxu0  ;;  %v2541_v55 = vpack.c.bf16 %v4779_v50, %v4777_v2 }
 0x307   :  { %v4183_v9 = vadd.f32 %v2420_v27, %v1843_v52  ;;  %v2422_v57 = vpop.f32.mrb[113].mxu0 }
 0x308   :  { %v2423_v34 = vpop.f32.mrb[114].mxu0  ;;  %3990 = vmatprep.mubr.msk.bf16.mxu1 %vm2586_vm0, %v2541_v55 }
 0x309   :  { %v4185_v19 = vadd.f32 %v2423_v34, %v1846_v53  ;;  %v2425_v31 = vpop.f32.mrb[115].mxu0  ;;  %4784 = vtanh.f32 %v4183_v9 }
 0x30b   :  { %4786 = vtanh.f32 %v4185_v19  ;;  %v4781_v7 = vpop.eup %4780 }
 0x30d   :  { %v4783_v20 = vpop.eup %4782 }
 0x30e   :  { %v2428_v21 = vpop.f32.mrb[116].mxu0  ;;  %v2542_v0 = vpack.c.bf16 %v4783_v20, %v4781_v7 }
 0x30f   :  { %v4187_v33 = vadd.f32 %v2428_v21, %v1851_v39  ;;  %v2430_v63 = vpop.f32.mrb[117].mxu0 }
 0x310   :  { %v2431_v36 = vpop.f32.mrb[118].mxu0  ;;  %3991 = vmatmul.mubr.msk.bf16.gmra.mrb[180].mxu1 %vm2586_vm0, %v2542_v0 }
 0x311   :  { %v4189_v37 = vadd.f32 %v2431_v36, %v1854_v54  ;;  %v2433_v45 = vpop.f32.mrb[119].mxu0  ;;  %4788 = vtanh.f32 %v4187_v33 }
 0x313   :  { %4790 = vtanh.f32 %v4189_v37  ;;  %v3940_v6 = vpop.f32.mrb[128].mxu1  ;;  %v4785_v42 = vpop.eup %4784 }
 0x314   :  { %v2726_v61 = vadd.f32 %v3940_v6, %v5503_v3  ;;  %v2717_v41 = vpop.f32.mrb[129].mxu1 }
 0x315   :  { %v4787_v49 = vpop.eup %4786  ;;  %v2718_v58 = vadd.f32 %v5503_v3, %v2717_v41  ;;  %v3941_v5 = vpop.f32.mrb[130].mxu1 }
 0x316   :  { %4792 = vtanh.f32 %v2726_v61  ;;  %v2729_v13 = vadd.f32 %v3941_v5, %v5503_v3  ;;  %v2436_v47 = vpop.f32.mrb[120].mxu0  ;;  %v2720_v32 = vpop.f32.mrb[131].mxu1  ;;  %v2543_v44 = vpack.c.bf16 %v4787_v49, %v4785_v42 }
 0x317   :  { %4794 = vtanh.f32 %v2718_v58  ;;  %v4191_v26 = vadd.f32 %v2436_v47, %v1859_v56  ;;  %v2721_v1 = vadd.f32 %v5503_v3, %v2720_v32  ;;  %v2438_v15 = vpop.f32.mrb[121].mxu0 }
 0x318   :  { %4796 = vtanh.f32 %v2729_v13  ;;  %v2439_v10 = vpop.f32.mrb[122].mxu0  ;;  %3994 = vmatprep.mubr.msk.bf16.mxu1 %vm2586_vm0, %v2543_v44 }
 0x319   :  { %4798 = vtanh.f32 %v4191_v26  ;;  %v4193_v43 = vadd.f32 %v2439_v10, %v1862_v8  ;;  %v2441_v25 = vpop.f32.mrb[123].mxu0 }
 0x31a   :  { %4800 = vtanh.f32 %v2721_v1 }
 0x31b   :  { %4802 = vtanh.f32 %v4193_v43  ;;  %v4789_v28 = vpop.eup %4788 }
 0x31d   :  { %v4791_v16 = vpop.eup %4790 }
 0x31e   :  { %v2444_v30 = vpop.f32.mrb[124].mxu0  ;;  %v2544_v14 = vpack.c.bf16 %v4791_v16, %v4789_v28 }
 0x31f   :  { %v4195_v60 = vadd.f32 %v2444_v30, %v1867_v11  ;;  %v2446_v12 = vpop.f32.mrb[125].mxu0 }
 0x320   :  { %v4793_v46 = vpop.eup %4792  ;;  %v2447_v35 = vpop.f32.mrb[126].mxu0  ;;  %3995 = vmatmul.mubr.msk.bf16.gmra.mrb[184].mxu1 %vm2586_vm0, %v2544_v14 }
 0x321   :  { %v4795_v48 = vpop.eup %4794  ;;  %v4197_v22 = vadd.f32 %v2447_v35, %v1870_v18  ;;  %v2449_v17 = vpop.f32.mrb[127].mxu0  ;;  %4804 = vtanh.f32 %v4195_v60 }
 0x322   :  { %v4797_v62 = vpop.eup %4796 }
 0x323   :  { %v4799_v40 = vpop.eup %4798  ;;  %v3037_v38 = vpack.c.bf16 %v4797_v62, %v4793_v46  ;;  %4806 = vtanh.f32 %v4197_v22  ;;  %v3944_v51 = vpop.f32.mrb[132].mxu1 }
 0x324   :  { %v4801_v23 = vpop.eup %4800  ;;  %v2742_v24 = vadd.f32 %v3944_v51, %v5503_v3  ;;  %v2733_v29 = vpop.f32.mrb[133].mxu1 }
 0x325   :  { %v4803_v4 = vpop.eup %4802  ;;  %v2734_v52 = vadd.f32 %v5503_v3, %v2733_v29  ;;  %v3945_v2 = vpop.f32.mrb[134].mxu1  ;;  %v3036_v50 = vpack.c.bf16 %v4801_v23, %v4795_v48 }
 0x326   :  { %4808 = vtanh.f32 %v2742_v24  ;;  %v2745_v27 = vadd.f32 %v3945_v2, %v5503_v3  ;;  %v2736_v55 = vpop.f32.mrb[135].mxu1  ;;  %v2545_v53 = vpack.c.bf16 %v4803_v4, %v4799_v40 }
 0x327   :  { %4810 = vtanh.f32 %v2734_v52  ;;  %v2737_v9 = vadd.f32 %v5503_v3, %v2736_v55 }
 0x328   :  { %4812 = vtanh.f32 %v2745_v27  ;;  %3998 = vmatprep.mubr.msk.bf16.mxu1 %vm2586_vm0, %v2545_v53 }
 0x329   :  { %4814 = vtanh.f32 %v2737_v9 }
 0x32b   :  { %v4805_v57 = vpop.eup %4804 }
 0x32d   :  { %v4807_v34 = vpop.eup %4806 }
 0x32e   :  { %v2546_v19 = vpack.c.bf16 %v4807_v34, %v4805_v57 }
 0x330   :  { %v4809_v31 = vpop.eup %4808  ;;  %3999 = vmatmul.mubr.msk.bf16.gmra.mrb[188].mxu1 %vm2586_vm0, %v2546_v19 }
 0x331   :  { %v4811_v39 = vpop.eup %4810  ;;  %4006 = vmatprep.mubr.msk.bf16.mxu1 %vm3091_vm1, %v3036_v50 }
 0x332   :  { %v4813_v7 = vpop.eup %4812 }
 0x333   :  { %v4815_v20 = vpop.eup %4814  ;;  %v3948_v21 = vpop.f32.mrb[136].mxu1  ;;  %v3039_v0 = vpack.c.bf16 %v4813_v7, %v4809_v31 }
 0x334   :  { %v2758_v54 = vadd.f32 %v3948_v21, %v5503_v3  ;;  %v2749_v33 = vpop.f32.mrb[137].mxu1  ;;  %v3038_v63 = vpack.c.bf16 %v4815_v20, %v4811_v39 }
 0x335   :  { %v2750_v36 = vadd.f32 %v5503_v3, %v2749_v33  ;;  %v3949_v37 = vpop.f32.mrb[138].mxu1 }
 0x336   :  { %4816 = vtanh.f32 %v2758_v54  ;;  %v2761_v45 = vadd.f32 %v3949_v37, %v5503_v3  ;;  %v2752_v56 = vpop.f32.mrb[139].mxu1 }
 0x337   :  { %4818 = vtanh.f32 %v2750_v36  ;;  %v2753_v6 = vadd.f32 %v5503_v3, %v2752_v56 }
 0x338   :  { %4820 = vtanh.f32 %v2761_v45  ;;  %4007 = vmatmul.mubr.msk.bf16.vlgmr.msra.gmra.mrb[192].mxu1 %vm3091_vm1, %v3037_v38 }
 0x339   :  { %4822 = vtanh.f32 %v2753_v6  ;;  %4010 = vmatprep.mubr.msk.bf16.mxu1 %vm3091_vm1, %v3038_v63 }
 0x340   :  { %v4817_v42 = vpop.eup %4816  ;;  %4011 = vmatmul.mubr.msk.bf16.gmra.mrb[196].mxu1 %vm3091_vm1, %v3039_v0 }
 0x341   :  { %v4819_v61 = vpop.eup %4818 }
 0x342   :  { %v4821_v41 = vpop.eup %4820 }
 0x343   :  { %v4823_v49 = vpop.eup %4822  ;;  %v3952_v58 = vpop.f32.mrb[140].mxu1  ;;  %v3041_v5 = vpack.c.bf16 %v4821_v41, %v4817_v42 }
 0x344   :  { %v2774_v13 = vadd.f32 %v3952_v58, %v5503_v3  ;;  %v2765_v47 = vpop.f32.mrb[141].mxu1  ;;  %v3040_v32 = vpack.c.bf16 %v4823_v49, %v4819_v61 }
 0x345   :  { %v2766_v44 = vadd.f32 %v5503_v3, %v2765_v47  ;;  %v3953_v59 = vpop.f32.mrb[142].mxu1 }
 0x346   :  { %4824 = vtanh.f32 %v2774_v13  ;;  %v2777_v8 = vadd.f32 %v3953_v59, %v5503_v3  ;;  %v2768_v26 = vpop.f32.mrb[143].mxu1  ;;  %4014 = vmatprep.mubr.msk.bf16.mxu1 %vm3091_vm1, %v3040_v32 }
 0x347   :  { %4826 = vtanh.f32 %v2766_v44  ;;  %v2769_v1 = vadd.f32 %v5503_v3, %v2768_v26 }
 0x348   :  { %4828 = vtanh.f32 %v2777_v8  ;;  %4015 = vmatmul.mubr.msk.bf16.gmra.mrb[200].mxu1 %vm3091_vm1, %v3041_v5 }
 0x349   :  { %4830 = vtanh.f32 %v2769_v1 }
 0x350   :  { %v4825_v15 = vpop.eup %4824 }
 0x351   :  { %v4827_v10 = vpop.eup %4826 }
 0x352   :  { %v4829_v43 = vpop.eup %4828 }
 0x353   :  { %v4831_v25 = vpop.eup %4830  ;;  %v3956_v11 = vpop.f32.mrb[144].mxu1  ;;  %v3043_v28 = vpack.c.bf16 %v4829_v43, %v4825_v15 }
 0x354   :  { %v2790_v16 = vadd.f32 %v3956_v11, %v5503_v3  ;;  %v2781_v30 = vpop.f32.mrb[145].mxu1  ;;  %v3042_v14 = vpack.c.bf16 %v4831_v25, %v4827_v10 }
 0x355   :  { %v2782_v18 = vadd.f32 %v5503_v3, %v2781_v30  ;;  %v3957_v60 = vpop.f32.mrb[146].mxu1 }
 0x356   :  { %4832 = vtanh.f32 %v2790_v16  ;;  %v2793_v12 = vadd.f32 %v3957_v60, %v5503_v3  ;;  %v2784_v46 = vpop.f32.mrb[147].mxu1  ;;  %4018 = vmatprep.mubr.msk.bf16.mxu1 %vm3091_vm1, %v3042_v14 }
 0x357   :  { %4834 = vtanh.f32 %v2782_v18  ;;  %v2785_v35 = vadd.f32 %v5503_v3, %v2784_v46  ;;  %4019 = vmatmul.mubr.msk.bf16.gmra.mrb[204].mxu1 %vm3091_vm1, %v3043_v28 }
 0x358   :  { %4836 = vtanh.f32 %v2793_v12 }
 0x359   :  { %4838 = vtanh.f32 %v2785_v35 }
 0x360   :  { %v4833_v48 = vpop.eup %4832 }
 0x361   :  { %v4835_v22 = vpop.eup %4834 }
 0x362   :  { %v4837_v17 = vpop.eup %4836 }
 0x363   :  { %v4839_v62 = vpop.eup %4838  ;;  %v3960_v40 = vpop.f32.mrb[148].mxu1  ;;  %v3045_v38 = vpack.c.bf16 %v4837_v17, %v4833_v48 }
 0x364   :  { %v2806_v51 = vadd.f32 %v3960_v40, %v5503_v3  ;;  %v2797_v23 = vpop.f32.mrb[149].mxu1  ;;  %v3044_v24 = vpack.c.bf16 %v4839_v62, %v4835_v22 }
 0x365   :  { %v2798_v29 = vadd.f32 %v5503_v3, %v2797_v23  ;;  %v3961_v4 = vpop.f32.mrb[150].mxu1 }
 0x366   :  { %4840 = vtanh.f32 %v2806_v51  ;;  %v2809_v52 = vadd.f32 %v3961_v4, %v5503_v3  ;;  %v2800_v2 = vpop.f32.mrb[151].mxu1  ;;  %4022 = vmatprep.mubr.msk.bf16.mxu1 %vm3091_vm1, %v3044_v24 }
 0x367   :  { %4842 = vtanh.f32 %v2798_v29  ;;  %v2801_v50 = vadd.f32 %v5503_v3, %v2800_v2  ;;  %4023 = vmatmul.mubr.msk.bf16.gmra.mrb[208].mxu1 %vm3091_vm1, %v3045_v38 }
 0x368   :  { %4844 = vtanh.f32 %v2809_v52 }
 0x369   :  { %4846 = vtanh.f32 %v2801_v50 }
 0x370   :  { %v4841_v27 = vpop.eup %4840 }
 0x371   :  { %v4843_v55 = vpop.eup %4842 }
 0x372   :  { %v4845_v53 = vpop.eup %4844 }
 0x373   :  { %v4847_v9 = vpop.eup %4846  ;;  %v3964_v57 = vpop.f32.mrb[152].mxu1  ;;  %v3047_v34 = vpack.c.bf16 %v4845_v53, %v4841_v27 }
 0x374   :  { %v2822_v19 = vadd.f32 %v3964_v57, %v5503_v3  ;;  %v2813_v31 = vpop.f32.mrb[153].mxu1  ;;  %v3046_v39 = vpack.c.bf16 %v4847_v9, %v4843_v55 }
 0x375   :  { %v2814_v7 = vadd.f32 %v5503_v3, %v2813_v31  ;;  %v3965_v20 = vpop.f32.mrb[154].mxu1 }
 0x376   :  { %4848 = vtanh.f32 %v2822_v19  ;;  %v2825_v21 = vadd.f32 %v3965_v20, %v5503_v3  ;;  %v2816_v0 = vpop.f32.mrb[155].mxu1  ;;  %4026 = vmatprep.mubr.msk.bf16.mxu1 %vm3091_vm1, %v3046_v39 }
 0x377   :  { %4850 = vtanh.f32 %v2814_v7  ;;  %v2817_v54 = vadd.f32 %v5503_v3, %v2816_v0  ;;  %4027 = vmatmul.mubr.msk.bf16.gmra.mrb[212].mxu1 %vm3091_vm1, %v3047_v34 }
 0x378   :  { %4852 = vtanh.f32 %v2825_v21 }
 0x379   :  { %4854 = vtanh.f32 %v2817_v54 }
 0x380   :  { %v4849_v33 = vpop.eup %4848 }
 0x381   :  { %v4851_v63 = vpop.eup %4850 }
 0x382   :  { %v4853_v36 = vpop.eup %4852 }
 0x383   :  { %v4855_v37 = vpop.eup %4854  ;;  %v3968_v45 = vpop.f32.mrb[156].mxu1  ;;  %v3049_v56 = vpack.c.bf16 %v4853_v36, %v4849_v33 }
 0x384   :  { %v2838_v6 = vadd.f32 %v3968_v45, %v5503_v3  ;;  %v2829_v42 = vpop.f32.mrb[157].mxu1  ;;  %v3048_v61 = vpack.c.bf16 %v4855_v37, %v4851_v63 }
 0x385   :  { %v2830_v41 = vadd.f32 %v5503_v3, %v2829_v42  ;;  %v3969_v49 = vpop.f32.mrb[158].mxu1 }
 0x386   :  { %4856 = vtanh.f32 %v2838_v6  ;;  %v2841_v58 = vadd.f32 %v3969_v49, %v5503_v3  ;;  %v2832_v5 = vpop.f32.mrb[159].mxu1  ;;  %4030 = vmatprep.mubr.msk.bf16.mxu1 %vm3091_vm1, %v3048_v61 }
 0x387   :  { %4858 = vtanh.f32 %v2830_v41  ;;  %v2833_v13 = vadd.f32 %v5503_v3, %v2832_v5  ;;  %4031 = vmatmul.mubr.msk.bf16.gmra.mrb[216].mxu1 %vm3091_vm1, %v3049_v56 }
 0x388   :  { %4860 = vtanh.f32 %v2841_v58 }
 0x389   :  { %4862 = vtanh.f32 %v2833_v13 }
 0x390   :  { %v4857_v47 = vpop.eup %4856 }
 0x391   :  { %v4859_v32 = vpop.eup %4858 }
 0x392   :  { %v4861_v44 = vpop.eup %4860 }
 0x393   :  { %v4863_v59 = vpop.eup %4862  ;;  %v3972_v8 = vpop.f32.mrb[160].mxu1  ;;  %v3051_v26 = vpack.c.bf16 %v4861_v44, %v4857_v47 }
 0x394   :  { %v2854_v1 = vadd.f32 %v3972_v8, %v5503_v3  ;;  %v2845_v15 = vpop.f32.mrb[161].mxu1  ;;  %v3050_v10 = vpack.c.bf16 %v4863_v59, %v4859_v32 }
 0x395   :  { %v2846_v43 = vadd.f32 %v5503_v3, %v2845_v15  ;;  %v3973_v25 = vpop.f32.mrb[162].mxu1 }
 0x396   :  { %4864 = vtanh.f32 %v2854_v1  ;;  %v2857_v11 = vadd.f32 %v3973_v25, %v5503_v3  ;;  %v2848_v28 = vpop.f32.mrb[163].mxu1  ;;  %4034 = vmatprep.mubr.msk.bf16.mxu1 %vm3091_vm1, %v3050_v10 }
 0x397   :  { %4866 = vtanh.f32 %v2846_v43  ;;  %v2849_v16 = vadd.f32 %v5503_v3, %v2848_v28  ;;  %4035 = vmatmul.mubr.msk.bf16.gmra.mrb[220].mxu1 %vm3091_vm1, %v3051_v26 }
 0x398   :  { %4868 = vtanh.f32 %v2857_v11 }
 0x399   :  { %4870 = vtanh.f32 %v2849_v16 }
 0x3a0   :  { %v4865_v30 = vpop.eup %4864 }
 0x3a1   :  { %v4867_v14 = vpop.eup %4866 }
 0x3a2   :  { %v4869_v18 = vpop.eup %4868 }
 0x3a3   :  { %v4871_v60 = vpop.eup %4870  ;;  %v3976_v12 = vpop.f32.mrb[164].mxu1  ;;  %v3053_v46 = vpack.c.bf16 %v4869_v18, %v4865_v30 }
 0x3a4   :  { %v2870_v35 = vadd.f32 %v3976_v12, %v5503_v3  ;;  %v2861_v48 = vpop.f32.mrb[165].mxu1  ;;  %v3052_v22 = vpack.c.bf16 %v4871_v60, %v4867_v14 }
 0x3a5   :  { %v2862_v17 = vadd.f32 %v5503_v3, %v2861_v48  ;;  %v3977_v62 = vpop.f32.mrb[166].mxu1 }
 0x3a6   :  { %4872 = vtanh.f32 %v2870_v35  ;;  %v2873_v40 = vadd.f32 %v3977_v62, %v5503_v3  ;;  %v2864_v38 = vpop.f32.mrb[167].mxu1  ;;  %4038 = vmatprep.mubr.msk.bf16.mxu1 %vm3091_vm1, %v3052_v22 }
 0x3a7   :  { %4874 = vtanh.f32 %v2862_v17  ;;  %v2865_v51 = vadd.f32 %v5503_v3, %v2864_v38  ;;  %4039 = vmatmul.mubr.msk.bf16.gmra.mrb[224].mxu1 %vm3091_vm1, %v3053_v46 }
 0x3a8   :  { %4876 = vtanh.f32 %v2873_v40 }
 0x3a9   :  { %4878 = vtanh.f32 %v2865_v51 }
 0x3b0   :  { %v4873_v23 = vpop.eup %4872 }
 0x3b1   :  { %v4875_v24 = vpop.eup %4874 }
 0x3b2   :  { %v4877_v29 = vpop.eup %4876 }
 0x3b3   :  { %v4879_v4 = vpop.eup %4878  ;;  %v3980_v52 = vpop.f32.mrb[168].mxu1  ;;  %v3055_v2 = vpack.c.bf16 %v4877_v29, %v4873_v23 }
 0x3b4   :  { %v2886_v50 = vadd.f32 %v3980_v52, %v5503_v3  ;;  %v2877_v27 = vpop.f32.mrb[169].mxu1  ;;  %v3054_v55 = vpack.c.bf16 %v4879_v4, %v4875_v24 }
 0x3b5   :  { %v2878_v53 = vadd.f32 %v5503_v3, %v2877_v27  ;;  %v3981_v9 = vpop.f32.mrb[170].mxu1 }
 0x3b6   :  { %4880 = vtanh.f32 %v2886_v50  ;;  %v2889_v57 = vadd.f32 %v3981_v9, %v5503_v3  ;;  %v2880_v34 = vpop.f32.mrb[171].mxu1  ;;  %4042 = vmatprep.mubr.msk.bf16.mxu1 %vm3091_vm1, %v3054_v55 }
 0x3b7   :  { %4882 = vtanh.f32 %v2878_v53  ;;  %v2881_v19 = vadd.f32 %v5503_v3, %v2880_v34  ;;  %4043 = vmatmul.mubr.msk.bf16.gmra.mrb[228].mxu1 %vm3091_vm1, %v3055_v2 }
 0x3b8   :  { %4884 = vtanh.f32 %v2889_v57 }
 0x3b9   :  { %4886 = vtanh.f32 %v2881_v19 }
 0x3c0   :  { %v4881_v31 = vpop.eup %4880 }
 0x3c1   :  { %v4883_v39 = vpop.eup %4882 }
 0x3c2   :  { %v4885_v7 = vpop.eup %4884 }
 0x3c3   :  { %v4887_v20 = vpop.eup %4886  ;;  %v3984_v21 = vpop.f32.mrb[172].mxu1  ;;  %v3057_v0 = vpack.c.bf16 %v4885_v7, %v4881_v31 }
 0x3c4   :  { %v2902_v54 = vadd.f32 %v3984_v21, %v5503_v3  ;;  %v2893_v33 = vpop.f32.mrb[173].mxu1  ;;  %v3056_v63 = vpack.c.bf16 %v4887_v20, %v4883_v39 }
 0x3c5   :  { %v2894_v36 = vadd.f32 %v5503_v3, %v2893_v33  ;;  %v3985_v37 = vpop.f32.mrb[174].mxu1  ;;  %v5614_v33 = vld [vmem:[%s5944_s6] ss:$0 sm:$0xff] }
 0x3c6   :  { %4888 = vtanh.f32 %v2902_v54  ;;  %v2905_v45 = vadd.f32 %v3985_v37, %v5503_v3  ;;  %v2896_v56 = vpop.f32.mrb[175].mxu1  ;;  %4046 = vmatprep.mubr.msk.bf16.mxu1 %vm3091_vm1, %v3056_v63 }
 0x3c7   :  { %4890 = vtanh.f32 %v2894_v36  ;;  %v2897_v6 = vadd.f32 %v5503_v3, %v2896_v56  ;;  %4047 = vmatmul.mubr.msk.bf16.gmra.mrb[232].mxu1 %vm3091_vm1, %v3057_v0 }
 0x3c8   :  { %4892 = vtanh.f32 %v2905_v45 }
 0x3c9   :  { %4894 = vtanh.f32 %v2897_v6 }
 0x3d0   :  { %v4889_v42 = vpop.eup %4888 }
 0x3d1   :  { %v4891_v61 = vpop.eup %4890 }
 0x3d2   :  { %v4893_v41 = vpop.eup %4892 }
 0x3d3   :  { %v4895_v49 = vpop.eup %4894  ;;  %v3988_v58 = vpop.f32.mrb[176].mxu1  ;;  %v3059_v5 = vpack.c.bf16 %v4893_v41, %v4889_v42 }
 0x3d4   :  { %v2918_v13 = vadd.f32 %v3988_v58, %v5503_v3  ;;  %v2909_v47 = vpop.f32.mrb[177].mxu1  ;;  %v3058_v32 = vpack.c.bf16 %v4895_v49, %v4891_v61 }
 0x3d5   :  { %v2910_v44 = vadd.f32 %v5503_v3, %v2909_v47  ;;  %v3989_v59 = vpop.f32.mrb[178].mxu1 }
 0x3d6   :  { %4896 = vtanh.f32 %v2918_v13  ;;  %v2921_v8 = vadd.f32 %v3989_v59, %v5503_v3  ;;  %v2912_v26 = vpop.f32.mrb[179].mxu1  ;;  %4050 = vmatprep.mubr.msk.bf16.mxu1 %vm3091_vm1, %v3058_v32 }
 0x3d7   :  { %4898 = vtanh.f32 %v2910_v44  ;;  %v2913_v1 = vadd.f32 %v5503_v3, %v2912_v26  ;;  %4051 = vmatmul.mubr.msk.bf16.gmra.mrb[236].mxu1 %vm3091_vm1, %v3059_v5 }
 0x3d8   :  { %4900 = vtanh.f32 %v2921_v8 }
 0x3d9   :  { %4902 = vtanh.f32 %v2913_v1 }
 0x3e0   :  { %v4897_v15 = vpop.eup %4896 }
 0x3e1   :  { %v4899_v10 = vpop.eup %4898 }
 0x3e2   :  { %v4901_v43 = vpop.eup %4900 }
 0x3e3   :  { %v4903_v25 = vpop.eup %4902  ;;  %v3992_v11 = vpop.f32.mrb[180].mxu1  ;;  %v3061_v28 = vpack.c.bf16 %v4901_v43, %v4897_v15 }
 0x3e4   :  { %v2934_v16 = vadd.f32 %v3992_v11, %v5503_v3  ;;  %v2925_v30 = vpop.f32.mrb[181].mxu1  ;;  %v3060_v14 = vpack.c.bf16 %v4903_v25, %v4899_v10 }
 0x3e5   :  { %v2926_v18 = vadd.f32 %v5503_v3, %v2925_v30  ;;  %v3993_v60 = vpop.f32.mrb[182].mxu1 }
 0x3e6   :  { %4904 = vtanh.f32 %v2934_v16  ;;  %v2937_v12 = vadd.f32 %v3993_v60, %v5503_v3  ;;  %v2928_v46 = vpop.f32.mrb[183].mxu1  ;;  %4054 = vmatprep.mubr.msk.bf16.mxu1 %vm3091_vm1, %v3060_v14 }
 0x3e7   :  { %4906 = vtanh.f32 %v2926_v18  ;;  %v2929_v35 = vadd.f32 %v5503_v3, %v2928_v46  ;;  %4055 = vmatmul.mubr.msk.bf16.gmra.mrb[240].mxu1 %vm3091_vm1, %v3061_v28 }
 0x3e8   :  { %4908 = vtanh.f32 %v2937_v12 }
 0x3e9   :  { %4910 = vtanh.f32 %v2929_v35 }
 0x3f0   :  { %v4905_v48 = vpop.eup %4904 }
 0x3f1   :  { %v4907_v22 = vpop.eup %4906 }
 0x3f2   :  { %v4909_v17 = vpop.eup %4908 }
 0x3f3   :  { %v4911_v62 = vpop.eup %4910  ;;  %v3996_v40 = vpop.f32.mrb[184].mxu1  ;;  %v3063_v38 = vpack.c.bf16 %v4909_v17, %v4905_v48 }
 0x3f4   :  { %v2950_v51 = vadd.f32 %v3996_v40, %v5503_v3  ;;  %v2941_v23 = vpop.f32.mrb[185].mxu1  ;;  %v3062_v24 = vpack.c.bf16 %v4911_v62, %v4907_v22 }
 0x3f5   :  { %v2942_v29 = vadd.f32 %v5503_v3, %v2941_v23  ;;  %v3997_v4 = vpop.f32.mrb[186].mxu1 }
 0x3f6   :  { %4912 = vtanh.f32 %v2950_v51  ;;  %v2953_v52 = vadd.f32 %v3997_v4, %v5503_v3  ;;  %v2944_v2 = vpop.f32.mrb[187].mxu1  ;;  %4058 = vmatprep.mubr.msk.bf16.mxu1 %vm3091_vm1, %v3062_v24 }
 0x3f7   :  { %4914 = vtanh.f32 %v2942_v29  ;;  %v2945_v50 = vadd.f32 %v5503_v3, %v2944_v2  ;;  %4059 = vmatmul.mubr.msk.bf16.gmra.mrb[244].mxu1 %vm3091_vm1, %v3063_v38 }
 0x3f8   :  { %4916 = vtanh.f32 %v2953_v52 }
 0x3f9   :  { %4918 = vtanh.f32 %v2945_v50 }
 0x400   :  { %v4913_v27 = vpop.eup %4912 }
 0x401   :  { %v4915_v55 = vpop.eup %4914 }
 0x402   :  { %v4917_v53 = vpop.eup %4916 }
 0x403   :  { %v4919_v9 = vpop.eup %4918  ;;  %v4000_v57 = vpop.f32.mrb[188].mxu1  ;;  %v3065_v34 = vpack.c.bf16 %v4917_v53, %v4913_v27 }
 0x404   :  { %v2966_v19 = vadd.f32 %v4000_v57, %v5503_v3  ;;  %v2957_v31 = vpop.f32.mrb[189].mxu1  ;;  %v3064_v39 = vpack.c.bf16 %v4919_v9, %v4915_v55 }
 0x405   :  { %v2958_v7 = vadd.f32 %v5503_v3, %v2957_v31  ;;  %v4001_v20 = vpop.f32.mrb[190].mxu1 }
 0x406   :  { %4920 = vtanh.f32 %v2966_v19  ;;  %v2969_v21 = vadd.f32 %v4001_v20, %v5503_v3  ;;  %v2960_v0 = vpop.f32.mrb[191].mxu1  ;;  %4062 = vmatprep.mubr.msk.bf16.mxu1 %vm3091_vm1, %v3064_v39 }
 0x407   :  { %4922 = vtanh.f32 %v2958_v7  ;;  %v2961_v54 = vadd.f32 %v5503_v3, %v2960_v0  ;;  %4063 = vmatmul.mubr.msk.bf16.gmra.mrb[248].mxu1 %vm3091_vm1, %v3065_v34 }
 0x408   :  { %4924 = vtanh.f32 %v2969_v21 }
 0x409   :  { %4926 = vtanh.f32 %v2961_v54 }
 0x40b   :  { %v4008_v63 = vpop.f32.mrb[192].mxu1 }
 0x40c   :  { %v3231_v36 = vadd.f32 %v4008_v63, %v5614_v33  ;;  %v3222_v37 = vpop.f32.mrb[193].mxu1 }
 0x40d   :  { %v3223_v45 = vadd.f32 %v5614_v33, %v3222_v37  ;;  %v4009_v56 = vpop.f32.mrb[194].mxu1 }
 0x40e   :  { %3480 = vst.msk [vmem:[%s5945_s7 + $0x10] sm:$0xff] %vm3477_vm2, %v3231_v36  ;;  %v3234_v3 = vadd.f32 %v4009_v56, %v5614_v33  ;;  %v3225_v6 = vpop.f32.mrb[195].mxu1 }
 0x40f   :  { %3478 = vst.msk [vmem:[%s5945_s7] sm:$0xff] %vm3477_vm2, %v3223_v45  ;;  %v3226_v42 = vadd.f32 %v5614_v33, %v3225_v6 }
 0x410   :  { %v4921_v61 = vpop.eup %4920  ;;  %3481 = vst.msk [vmem:[%s5945_s7 + $0x18] sm:$0xff] %vm3477_vm2, %v3234_v3 }
 0x411   :  { %v4923_v41 = vpop.eup %4922  ;;  %3479 = vst.msk [vmem:[%s5945_s7 + $0x8] sm:$0xff] %vm3477_vm2, %v3226_v42 }
 0x412   :  { %v4925_v49 = vpop.eup %4924 }
 0x413   :  { %v4927_v58 = vpop.eup %4926  ;;  %v4012_v5 = vpop.f32.mrb[196].mxu1  ;;  %v3067_v13 = vpack.c.bf16 %v4925_v49, %v4921_v61 }
 0x414   :  { %v3247_v47 = vadd.f32 %v4012_v5, %v5614_v33  ;;  %v3238_v32 = vpop.f32.mrb[197].mxu1  ;;  %v3066_v44 = vpack.c.bf16 %v4927_v58, %v4923_v41 }
 0x415   :  { %v3239_v59 = vadd.f32 %v5614_v33, %v3238_v32  ;;  %v4013_v8 = vpop.f32.mrb[198].mxu1 }
 0x416   :  { %3484 = vst.msk [vmem:[%s5945_s7 + $0x30] sm:$0xff] %vm3477_vm2, %v3247_v47  ;;  %v3250_v26 = vadd.f32 %v4013_v8, %v5614_v33  ;;  %v3241_v1 = vpop.f32.mrb[199].mxu1  ;;  %4066 = vmatprep.mubr.msk.bf16.mxu1 %vm3091_vm1, %v3066_v44 }
 0x417   :  { %3482 = vst.msk [vmem:[%s5945_s7 + $0x20] sm:$0xff] %vm3477_vm2, %v3239_v59  ;;  %v3242_v15 = vadd.f32 %v5614_v33, %v3241_v1  ;;  %4067 = vmatmul.mubr.msk.bf16.gmra.mrb[252].mxu1 %vm3091_vm1, %v3067_v13 }
 0x418   :  { %3485 = vst.msk [vmem:[%s5945_s7 + $0x38] sm:$0xff] %vm3477_vm2, %v3250_v26 }
 0x419   :  { %3483 = vst.msk [vmem:[%s5945_s7 + $0x28] sm:$0xff] %vm3477_vm2, %v3242_v15 }
 0x41b   :  { %v4016_v10 = vpop.f32.mrb[200].mxu1 }
 0x41c   :  { %v3263_v43 = vadd.f32 %v4016_v10, %v5614_v33  ;;  %v3254_v25 = vpop.f32.mrb[201].mxu1 }
 0x41d   :  { %v3255_v11 = vadd.f32 %v5614_v33, %v3254_v25  ;;  %v4017_v28 = vpop.f32.mrb[202].mxu1 }
 0x41e   :  { %3488 = vst.msk [vmem:[%s5945_s7 + $0x50] sm:$0xff] %vm3477_vm2, %v3263_v43  ;;  %v3266_v16 = vadd.f32 %v4017_v28, %v5614_v33  ;;  %v3257_v30 = vpop.f32.mrb[203].mxu1 }
 0x41f   :  { %3486 = vst.msk [vmem:[%s5945_s7 + $0x40] sm:$0xff] %vm3477_vm2, %v3255_v11  ;;  %v3258_v14 = vadd.f32 %v5614_v33, %v3257_v30 }
 0x420   :  { %3489 = vst.msk [vmem:[%s5945_s7 + $0x58] sm:$0xff] %vm3477_vm2, %v3266_v16 }
 0x421   :  { %3487 = vst.msk [vmem:[%s5945_s7 + $0x48] sm:$0xff] %vm3477_vm2, %v3258_v14 }
 0x42a   :  { %v4020_v18 = vpop.f32.mrb[204].mxu1 }
 0x42b   :  { %v3279_v60 = vadd.f32 %v4020_v18, %v5614_v33  ;;  %v3270_v12 = vpop.f32.mrb[205].mxu1 }
 0x42c   :  { %v3271_v46 = vadd.f32 %v5614_v33, %v3270_v12  ;;  %v4021_v35 = vpop.f32.mrb[206].mxu1 }
 0x42d   :  { %3492 = vst.msk [vmem:[%s5945_s7 + $0x70] sm:$0xff] %vm3477_vm2, %v3279_v60  ;;  %v3282_v48 = vadd.f32 %v4021_v35, %v5614_v33  ;;  %v3273_v22 = vpop.f32.mrb[207].mxu1 }
 0x42e   :  { %3490 = vst.msk [vmem:[%s5945_s7 + $0x60] sm:$0xff] %vm3477_vm2, %v3271_v46  ;;  %v3274_v17 = vadd.f32 %v5614_v33, %v3273_v22 }
 0x42f   :  { %3493 = vst.msk [vmem:[%s5945_s7 + $0x78] sm:$0xff] %vm3477_vm2, %v3282_v48 }
 0x430   :  { %3491 = vst.msk [vmem:[%s5945_s7 + $0x68] sm:$0xff] %vm3477_vm2, %v3274_v17 }
 0x43a   :  { %v4024_v62 = vpop.f32.mrb[208].mxu1 }
 0x43b   :  { %v3295_v40 = vadd.f32 %v4024_v62, %v5614_v33  ;;  %v3286_v38 = vpop.f32.mrb[209].mxu1 }
 0x43c   :  { %v3287_v51 = vadd.f32 %v5614_v33, %v3286_v38  ;;  %v4025_v23 = vpop.f32.mrb[210].mxu1 }
 0x43d   :  { %3496 = vst.msk [vmem:[%s5945_s7 + $0x90] sm:$0xff] %vm3477_vm2, %v3295_v40  ;;  %v3298_v24 = vadd.f32 %v4025_v23, %v5614_v33  ;;  %v3289_v29 = vpop.f32.mrb[211].mxu1 }
 0x43e   :  { %3494 = vst.msk [vmem:[%s5945_s7 + $0x80] sm:$0xff] %vm3477_vm2, %v3287_v51  ;;  %v3290_v4 = vadd.f32 %v5614_v33, %v3289_v29 }
 0x43f   :  { %3497 = vst.msk [vmem:[%s5945_s7 + $0x98] sm:$0xff] %vm3477_vm2, %v3298_v24 }
 0x440   :  { %3495 = vst.msk [vmem:[%s5945_s7 + $0x88] sm:$0xff] %vm3477_vm2, %v3290_v4 }
 0x44a   :  { %v4028_v52 = vpop.f32.mrb[212].mxu1 }
 0x44b   :  { %v3311_v2 = vadd.f32 %v4028_v52, %v5614_v33  ;;  %v3302_v50 = vpop.f32.mrb[213].mxu1 }
 0x44c   :  { %v3303_v27 = vadd.f32 %v5614_v33, %v3302_v50  ;;  %v4029_v55 = vpop.f32.mrb[214].mxu1 }
 0x44d   :  { %3500 = vst.msk [vmem:[%s5945_s7 + $0xb0] sm:$0xff] %vm3477_vm2, %v3311_v2  ;;  %v3314_v53 = vadd.f32 %v4029_v55, %v5614_v33  ;;  %v3305_v9 = vpop.f32.mrb[215].mxu1 }
 0x44e   :  { %3498 = vst.msk [vmem:[%s5945_s7 + $0xa0] sm:$0xff] %vm3477_vm2, %v3303_v27  ;;  %v3306_v57 = vadd.f32 %v5614_v33, %v3305_v9 }
 0x44f   :  { %3501 = vst.msk [vmem:[%s5945_s7 + $0xb8] sm:$0xff] %vm3477_vm2, %v3314_v53 }
 0x450   :  { %3499 = vst.msk [vmem:[%s5945_s7 + $0xa8] sm:$0xff] %vm3477_vm2, %v3306_v57 }
 0x45a   :  { %v4032_v34 = vpop.f32.mrb[216].mxu1 }
 0x45b   :  { %v3327_v19 = vadd.f32 %v4032_v34, %v5614_v33  ;;  %v3318_v31 = vpop.f32.mrb[217].mxu1 }
 0x45c   :  { %v3319_v39 = vadd.f32 %v5614_v33, %v3318_v31  ;;  %v4033_v7 = vpop.f32.mrb[218].mxu1 }
 0x45d   :  { %3504 = vst.msk [vmem:[%s5945_s7 + $0xd0] sm:$0xff] %vm3477_vm2, %v3327_v19  ;;  %v3330_v20 = vadd.f32 %v4033_v7, %v5614_v33  ;;  %v3321_v21 = vpop.f32.mrb[219].mxu1 }
 0x45e   :  { %3502 = vst.msk [vmem:[%s5945_s7 + $0xc0] sm:$0xff] %vm3477_vm2, %v3319_v39  ;;  %v3322_v0 = vadd.f32 %v5614_v33, %v3321_v21 }
 0x45f   :  { %3505 = vst.msk [vmem:[%s5945_s7 + $0xd8] sm:$0xff] %vm3477_vm2, %v3330_v20 }
 0x460   :  { %3503 = vst.msk [vmem:[%s5945_s7 + $0xc8] sm:$0xff] %vm3477_vm2, %v3322_v0 }
 0x46a   :  { %v4036_v54 = vpop.f32.mrb[220].mxu1 }
 0x46b   :  { %v3343_v63 = vadd.f32 %v4036_v54, %v5614_v33  ;;  %v3334_v36 = vpop.f32.mrb[221].mxu1 }
 0x46c   :  { %v3335_v37 = vadd.f32 %v5614_v33, %v3334_v36  ;;  %v4037_v45 = vpop.f32.mrb[222].mxu1 }
 0x46d   :  { %3508 = vst.msk [vmem:[%s5945_s7 + $0xf0] sm:$0xff] %vm3477_vm2, %v3343_v63  ;;  %v3346_v56 = vadd.f32 %v4037_v45, %v5614_v33  ;;  %v3337_v3 = vpop.f32.mrb[223].mxu1 }
 0x46e   :  { %3506 = vst.msk [vmem:[%s5945_s7 + $0xe0] sm:$0xff] %vm3477_vm2, %v3335_v37  ;;  %v3338_v6 = vadd.f32 %v5614_v33, %v3337_v3 }
 0x46f   :  { %3509 = vst.msk [vmem:[%s5945_s7 + $0xf8] sm:$0xff] %vm3477_vm2, %v3346_v56 }
 0x470   :  { %3507 = vst.msk [vmem:[%s5945_s7 + $0xe8] sm:$0xff] %vm3477_vm2, %v3338_v6 }
 0x47a   :  { %v4040_v42 = vpop.f32.mrb[224].mxu1 }
 0x47b   :  { %v3359_v61 = vadd.f32 %v4040_v42, %v5614_v33  ;;  %v3350_v41 = vpop.f32.mrb[225].mxu1 }
 0x47c   :  { %v3351_v49 = vadd.f32 %v5614_v33, %v3350_v41  ;;  %v4041_v58 = vpop.f32.mrb[226].mxu1 }
 0x47d   :  { %3512 = vst.msk [vmem:[%s5945_s7 + $0x110] sm:$0xff] %vm3477_vm2, %v3359_v61  ;;  %v3362_v5 = vadd.f32 %v4041_v58, %v5614_v33  ;;  %v3353_v13 = vpop.f32.mrb[227].mxu1 }
 0x47e   :  { %3510 = vst.msk [vmem:[%s5945_s7 + $0x100] sm:$0xff] %vm3477_vm2, %v3351_v49  ;;  %v3354_v47 = vadd.f32 %v5614_v33, %v3353_v13 }
 0x47f   :  { %3513 = vst.msk [vmem:[%s5945_s7 + $0x118] sm:$0xff] %vm3477_vm2, %v3362_v5 }
 0x480   :  { %3511 = vst.msk [vmem:[%s5945_s7 + $0x108] sm:$0xff] %vm3477_vm2, %v3354_v47 }
 0x48a   :  { %v4044_v32 = vpop.f32.mrb[228].mxu1 }
 0x48b   :  { %v3375_v44 = vadd.f32 %v4044_v32, %v5614_v33  ;;  %v3366_v59 = vpop.f32.mrb[229].mxu1 }
 0x48c   :  { %v3367_v8 = vadd.f32 %v5614_v33, %v3366_v59  ;;  %v4045_v26 = vpop.f32.mrb[230].mxu1 }
 0x48d   :  { %3516 = vst.msk [vmem:[%s5945_s7 + $0x130] sm:$0xff] %vm3477_vm2, %v3375_v44  ;;  %v3378_v1 = vadd.f32 %v4045_v26, %v5614_v33  ;;  %v3369_v15 = vpop.f32.mrb[231].mxu1 }
 0x48e   :  { %3514 = vst.msk [vmem:[%s5945_s7 + $0x120] sm:$0xff] %vm3477_vm2, %v3367_v8  ;;  %v3370_v10 = vadd.f32 %v5614_v33, %v3369_v15 }
 0x48f   :  { %3517 = vst.msk [vmem:[%s5945_s7 + $0x138] sm:$0xff] %vm3477_vm2, %v3378_v1 }
 0x490   :  { %3515 = vst.msk [vmem:[%s5945_s7 + $0x128] sm:$0xff] %vm3477_vm2, %v3370_v10 }
 0x49a   :  { %v4048_v43 = vpop.f32.mrb[232].mxu1 }
 0x49b   :  { %v3391_v25 = vadd.f32 %v4048_v43, %v5614_v33  ;;  %v3382_v11 = vpop.f32.mrb[233].mxu1 }
 0x49c   :  { %v3383_v28 = vadd.f32 %v5614_v33, %v3382_v11  ;;  %v4049_v16 = vpop.f32.mrb[234].mxu1 }
 0x49d   :  { %3520 = vst.msk [vmem:[%s5945_s7 + $0x150] sm:$0xff] %vm3477_vm2, %v3391_v25  ;;  %v3394_v30 = vadd.f32 %v4049_v16, %v5614_v33  ;;  %v3385_v14 = vpop.f32.mrb[235].mxu1 }
 0x49e   :  { %3518 = vst.msk [vmem:[%s5945_s7 + $0x140] sm:$0xff] %vm3477_vm2, %v3383_v28  ;;  %v3386_v18 = vadd.f32 %v5614_v33, %v3385_v14 }
 0x49f   :  { %3521 = vst.msk [vmem:[%s5945_s7 + $0x158] sm:$0xff] %vm3477_vm2, %v3394_v30 }
 0x4a0   :  { %3519 = vst.msk [vmem:[%s5945_s7 + $0x148] sm:$0xff] %vm3477_vm2, %v3386_v18 }
 0x4aa   :  { %v4052_v60 = vpop.f32.mrb[236].mxu1 }
 0x4ab   :  { %v3407_v12 = vadd.f32 %v4052_v60, %v5614_v33  ;;  %v3398_v46 = vpop.f32.mrb[237].mxu1 }
 0x4ac   :  { %v3399_v35 = vadd.f32 %v5614_v33, %v3398_v46  ;;  %v4053_v48 = vpop.f32.mrb[238].mxu1 }
 0x4ad   :  { %3524 = vst.msk [vmem:[%s5945_s7 + $0x170] sm:$0xff] %vm3477_vm2, %v3407_v12  ;;  %v3410_v22 = vadd.f32 %v4053_v48, %v5614_v33  ;;  %v3401_v17 = vpop.f32.mrb[239].mxu1 }
 0x4ae   :  { %3522 = vst.msk [vmem:[%s5945_s7 + $0x160] sm:$0xff] %vm3477_vm2, %v3399_v35  ;;  %v3402_v62 = vadd.f32 %v5614_v33, %v3401_v17 }
 0x4af   :  { %3525 = vst.msk [vmem:[%s5945_s7 + $0x178] sm:$0xff] %vm3477_vm2, %v3410_v22 }
 0x4b0   :  { %3523 = vst.msk [vmem:[%s5945_s7 + $0x168] sm:$0xff] %vm3477_vm2, %v3402_v62 }
 0x4ba   :  { %v4056_v40 = vpop.f32.mrb[240].mxu1 }
 0x4bb   :  { %v3423_v38 = vadd.f32 %v4056_v40, %v5614_v33  ;;  %v3414_v51 = vpop.f32.mrb[241].mxu1 }
 0x4bc   :  { %v3415_v23 = vadd.f32 %v5614_v33, %v3414_v51  ;;  %v4057_v24 = vpop.f32.mrb[242].mxu1 }
 0x4bd   :  { %3528 = vst.msk [vmem:[%s5945_s7 + $0x190] sm:$0xff] %vm3477_vm2, %v3423_v38  ;;  %v3426_v29 = vadd.f32 %v4057_v24, %v5614_v33  ;;  %v3417_v4 = vpop.f32.mrb[243].mxu1 }
 0x4be   :  { %3526 = vst.msk [vmem:[%s5945_s7 + $0x180] sm:$0xff] %vm3477_vm2, %v3415_v23  ;;  %v3418_v52 = vadd.f32 %v5614_v33, %v3417_v4 }
 0x4bf   :  { %3529 = vst.msk [vmem:[%s5945_s7 + $0x198] sm:$0xff] %vm3477_vm2, %v3426_v29 }
 0x4c0   :  { %3527 = vst.msk [vmem:[%s5945_s7 + $0x188] sm:$0xff] %vm3477_vm2, %v3418_v52 }
 0x4ca   :  { %v4060_v2 = vpop.f32.mrb[244].mxu1 }
 0x4cb   :  { %v3439_v50 = vadd.f32 %v4060_v2, %v5614_v33  ;;  %v3430_v27 = vpop.f32.mrb[245].mxu1 }
 0x4cc   :  { %v3431_v55 = vadd.f32 %v5614_v33, %v3430_v27  ;;  %v4061_v53 = vpop.f32.mrb[246].mxu1 }
 0x4cd   :  { %3532 = vst.msk [vmem:[%s5945_s7 + $0x1b0] sm:$0xff] %vm3477_vm2, %v3439_v50  ;;  %v3442_v9 = vadd.f32 %v4061_v53, %v5614_v33  ;;  %v3433_v57 = vpop.f32.mrb[247].mxu1 }
 0x4ce   :  { %3530 = vst.msk [vmem:[%s5945_s7 + $0x1a0] sm:$0xff] %vm3477_vm2, %v3431_v55  ;;  %v3434_v34 = vadd.f32 %v5614_v33, %v3433_v57 }
 0x4cf   :  { %3533 = vst.msk [vmem:[%s5945_s7 + $0x1b8] sm:$0xff] %vm3477_vm2, %v3442_v9 }
 0x4d0   :  { %3531 = vst.msk [vmem:[%s5945_s7 + $0x1a8] sm:$0xff] %vm3477_vm2, %v3434_v34 }
 0x4da   :  { %v4064_v19 = vpop.f32.mrb[248].mxu1 }
 0x4db   :  { %v3455_v31 = vadd.f32 %v4064_v19, %v5614_v33  ;;  %v3446_v39 = vpop.f32.mrb[249].mxu1 }
 0x4dc   :  { %v3447_v7 = vadd.f32 %v5614_v33, %v3446_v39  ;;  %v4065_v20 = vpop.f32.mrb[250].mxu1 }
 0x4dd   :  { %3536 = vst.msk [vmem:[%s5945_s7 + $0x1d0] sm:$0xff] %vm3477_vm2, %v3455_v31  ;;  %v3458_v21 = vadd.f32 %v4065_v20, %v5614_v33  ;;  %v3449_v0 = vpop.f32.mrb[251].mxu1 }
 0x4de   :  { %3534 = vst.msk [vmem:[%s5945_s7 + $0x1c0] sm:$0xff] %vm3477_vm2, %v3447_v7  ;;  %v3450_v54 = vadd.f32 %v5614_v33, %v3449_v0 }
 0x4df   :  { %3537 = vst.msk [vmem:[%s5945_s7 + $0x1d8] sm:$0xff] %vm3477_vm2, %v3458_v21 }
 0x4e0   :  { %3535 = vst.msk [vmem:[%s5945_s7 + $0x1c8] sm:$0xff] %vm3477_vm2, %v3450_v54 }
 0x4ea   :  { %v4068_v63 = vpop.f32.mrb[252].mxu1 }
 0x4eb   :  { %v3471_v36 = vadd.f32 %v4068_v63, %v5614_v33  ;;  %v3462_v37 = vpop.f32.mrb[253].mxu1 }
 0x4ec   :  { %v3463_v45 = vadd.f32 %v5614_v33, %v3462_v37  ;;  %v4069_v56 = vpop.f32.mrb[254].mxu1 }
 0x4ed   :  { %3540 = vst.msk [vmem:[%s5945_s7 + $0x1f0] sm:$0xff] %vm3477_vm2, %v3471_v36  ;;  %v3474_v3 = vadd.f32 %v4069_v56, %v5614_v33  ;;  %v3465_v6 = vpop.f32.mrb[255].mxu1 }
 0x4ee   :  { %3538 = vst.msk [vmem:[%s5945_s7 + $0x1e0] sm:$0xff] %vm3477_vm2, %v3463_v45  ;;  %v3466_v42 = vadd.f32 %v5614_v33, %v3465_v6 }
 0x4ef   :  { %3541 = vst.msk [vmem:[%s5945_s7 + $0x1f8] sm:$0xff] %vm3477_vm2, %v3474_v3 }
 0x4f0   :  { %3539 = vst.msk [vmem:[%s5945_s7 + $0x1e8] sm:$0xff] %vm3477_vm2, %v3466_v42 }
 0x4f1   :  { %3546 = vsyncpa [#allocation3], 1 }

</bundles_post_ra>
